<compile_context>
chip_gen: v5e
topology: v5e:2x2
jax: 0.10.0
libtpu: 0.0.40
codegen_flags: <defaults>
</compile_context>

<pallas_src>
import functools

import numpy as np
import jax
import jax.numpy as jnp
from jax import lax
from jax.experimental import pallas as pl
from jax.experimental.pallas import tpu as pltpu

LEAKY_SLOPE = 0.01   # nn.LeakyReLU default
BN_EPS = 1e-5        # nn.BatchNorm3d default


def _round_up(x, m):
    return ((x + m - 1) // m) * m


# ----------------------------- Pallas kernels ------------------------------ #

def _conv_pool_stats_kernel(p_ref, w_ref, b_ref, o_ref, sum_ref, sq_ref, *, kk):
    # p_ref: (KK, K_pad, TMp) bf16 pool-window-major im2col patches (lane-dense)
    # w_ref: (OC, K_pad)      bf16 conv weights
    # b_ref: (OC, 1)          f32  conv bias
    # o_ref: (OC, TMp)        bf16 pooled conv+bias output
    # sum_ref/sq_ref: (1, OC, 1) f32 per-tile partial sums of the BIAS-FREE conv-max
    w = w_ref[...]                                            # load once; reused by all KK dots
    acc = jnp.dot(w, p_ref[0], preferred_element_type=jnp.float32)
    for t in range(1, kk):                                    # max-pool fused into the epilogue
        acc = jnp.maximum(acc, jnp.dot(w, p_ref[t], preferred_element_type=jnp.float32))

    # pooled conv + bias (bf16 writeback); max(conv)+bias == max(conv+bias)
    o_ref[...] = (acc + b_ref[...]).astype(o_ref.dtype)

    # per-tile partial statistics on the bias-free conv-max (f32).
    # Padded lanes contribute exactly 0 (max over W@0 = 0), so no masking/correction needed.
    oc = acc.shape[0]
    sum_ref[...] = jnp.sum(acc, axis=1, keepdims=True).reshape(1, oc, 1)
    sq_ref[...] = jnp.sum(acc * acc, axis=1, keepdims=True).reshape(1, oc, 1)


def _bn_lrelu_kernel(y_ref, scale_ref, shift_ref, o_ref):
    # y_ref: (OC, TMp2) bf16; scale/shift: (OC, 1) f32 precomputed BN affine
    z = y_ref[...].astype(jnp.float32) * scale_ref[...] + shift_ref[...]
    o_ref[...] = jnp.where(z >= 0, z, LEAKY_SLOPE * z).astype(o_ref.dtype)


# ------------------------------- wrapper ----------------------------------- #

@functools.partial(jax.jit, static_argnames=("kernel_size_conv", "kernel_size_pool", "stride"))
def conv3d_block_forward(x, w, b, gamma, beta,
                         kernel_size_conv=(3, 3, 3),
                         kernel_size_pool=(2, 2, 2),
                         stride=(2, 2, 2)):
    N, C, D, H, W = x.shape
    OC = w.shape[0]
    kd, kh, kw = kernel_size_conv
    pd, ph, pw = kernel_size_pool
    sd, sh, sw = stride
    assert (pd, ph, pw) == (sd, sh, sw), "pool fusion assumes kernel_size_pool == stride"

    Do, Ho, Wo = D - kd + 1, H - kh + 1, W - kw + 1           # padding_conv = 0 (default)
    Dp, Hp, Wp = (Do - pd) // sd + 1, (Ho - ph) // sh + 1, (Wo - pw) // sw + 1   # floor mode
    Dc, Hc, Wc = Dp * pd, Hp * ph, Wp * pw                    # conv positions actually consumed

    K = C * kd * kh * kw
    KK = pd * ph * pw
    Mp = N * Dp * Hp * Wp
    K_pad = _round_up(K, 8)                                   # clean (8,128) sublane tiling

    # ---- tile sizing (VMEM-budget driven) ----
    # double-buffered bf16 patch block must stay under PATCH_BUDGET; lane tile capped at 2048.
    PATCH_BUDGET = 20 * 1024 * 1024
    tmp_cap = max(128, (PATCH_BUDGET // (2 * KK * K_pad * 2)) // 128 * 128)
    TMp = max(128, min(2048, tmp_cap, _round_up(Mp, 128)))    # kernel-1 lane tile
    g = max(1, min(16384 // TMp, (Mp + TMp - 1) // TMp))
    TMp2 = TMp * g                                            # kernel-2 lane tile (multiple of TMp)
    Mp_pad = _round_up(Mp, TMp2)
    n_tiles1 = Mp_pad // TMp
    n_tiles2 = Mp_pad // TMp2

    # ---- pooled-window-major im2col (XLA glue, bf16) ----
    xb = x.astype(jnp.bfloat16)
    cols = []
    for a in range(kd):
        for bb in range(kh):
            for c in range(kw):
                cols.append(xb[:, :, a:a + Dc, bb:bb + Hc, c:c + Wc])
    p = jnp.stack(cols, axis=0)                               # (kd*kh*kw, N, C, Dc, Hc, Wc)
    p = p.reshape(kd * kh * kw, N, C, Dp, pd, Hp, ph, Wp, pw)
    p = jnp.transpose(p, (4, 6, 8, 2, 0, 1, 3, 5, 7))         # (pd,ph,pw, C, koff, N,Dp,Hp,Wp)
    p = p.reshape(KK, K, Mp)
    p = jnp.pad(p, ((0, 0), (0, K_pad - K), (0, Mp_pad - Mp)))  # zero-pad K and lanes

    w2 = jnp.pad(w.reshape(OC, K).astype(jnp.bfloat16), ((0, 0), (0, K_pad - K)))
    b2 = b.reshape(OC, 1).astype(jnp.float32)

    pooled2d, part_sum, part_sq = pl.pallas_call(
        functools.partial(_conv_pool_stats_kernel, kk=KK),
        out_shape=(jax.ShapeDtypeStruct((OC, Mp_pad), jnp.bfloat16),
                   jax.ShapeDtypeStruct((n_tiles1, OC, 1), jnp.float32),
                   jax.ShapeDtypeStruct((n_tiles1, OC, 1), jnp.float32)),
        grid_spec=pltpu.PrefetchScalarGridSpec(
            num_scalar_prefetch=0,
            grid=(n_tiles1,),
            in_specs=[pl.BlockSpec((KK, K_pad, TMp), lambda i: (0, 0, i)),
                      pl.BlockSpec((OC, K_pad), lambda i: (0, 0)),
                      pl.BlockSpec((OC, 1), lambda i: (0, 0))],
            out_specs=(pl.BlockSpec((OC, TMp), lambda i: (0, i)),
                       pl.BlockSpec((1, OC, 1), lambda i: (i, 0, 0)),
                       pl.BlockSpec((1, OC, 1), lambda i: (i, 0, 0)))),
        compiler_params=pltpu.CompilerParams(
            dimension_semantics=("parallel",),                # per-tile partial stats -> no reduction axis
            vmem_limit_bytes=32 * 1024 * 1024),
    )(p, w2, b2)

    # ---- BatchNorm (training-mode batch stats): tiny (OC,)-sized f32 math, done once ----
    cnt = jnp.float32(Mp)
    sum_c = jnp.sum(part_sum[:, :, 0], axis=0)                # (OC,) sums of bias-free conv-max
    sq_c = jnp.sum(part_sq[:, :, 0], axis=0)
    mean_c = sum_c / cnt
    mean = mean_c + b.astype(jnp.float32)                     # re-add bias to the mean
    var = jnp.maximum(sq_c / cnt - mean_c * mean_c, 0.0)      # bias-centered -> less cancellation
    inv = lax.rsqrt(var + BN_EPS)
    scale_v = gamma.astype(jnp.float32) * inv
    shift_v = beta.astype(jnp.float32) - mean * scale_v
    scale = scale_v.reshape(OC, 1)
    shift = shift_v.reshape(OC, 1)

    out2d = pl.pallas_call(
        _bn_lrelu_kernel,
        out_shape=jax.ShapeDtypeStruct((OC, Mp_pad), x.dtype),
        grid_spec=pltpu.PrefetchScalarGridSpec(
            num_scalar_prefetch=0,
            grid=(n_tiles2,),
            in_specs=[pl.BlockSpec((OC, TMp2), lambda i: (0, i)),
                      pl.BlockSpec((OC, 1), lambda i: (0, 0)),
                      pl.BlockSpec((OC, 1), lambda i: (0, 0))],
            out_specs=pl.BlockSpec((OC, TMp2), lambda i: (0, i))),
        compiler_params=pltpu.CompilerParams(
            dimension_semantics=("parallel",),
            vmem_limit_bytes=32 * 1024 * 1024),
    )(pooled2d, scale, shift)

    out = out2d[:, :Mp].reshape(OC, N, Dp, Hp, Wp)
    return jnp.transpose(out, (1, 0, 2, 3, 4))                # back to NCDHW


# ----------------------------- pure-JAX reference --------------------------- #

def reference(x, w, b, gamma, beta):
    y = lax.conv_general_dilated(x, w, window_strides=(1, 1, 1), padding="VALID",
                                 dimension_numbers=("NCDHW", "OIDHW", "NCDHW"))
    y = y + b.reshape(1, -1, 1, 1, 1)
    y = lax.reduce_window(y, -jnp.inf, lax.max,
                          window_dimensions=(1, 1, 2, 2, 2),
                          window_strides=(1, 1, 2, 2, 2), padding="VALID")
    mean = jnp.mean(y, axis=(0, 2, 3, 4), keepdims=True)
    var = jnp.mean((y - mean) ** 2, axis=(0, 2, 3, 4), keepdims=True)
    yn = (y - mean) / jnp.sqrt(var + BN_EPS) * gamma.reshape(1, -1, 1, 1, 1) \
         + beta.reshape(1, -1, 1, 1, 1)
    return jnp.where(yn >= 0, yn, LEAKY_SLOPE * yn)


# --------------------------------- main ------------------------------------ #

if __name__ == "__main__":
    key = jax.random.PRNGKey(0)
    kx, kw_, kb = jax.random.split(key, 3)

    N, C, D, H, W = 2, 4, 8, 16, 16
    OC = 8
    ksz = (3, 3, 3)

    x = jax.random.normal(kx, (N, C, D, H, W), jnp.float32)
    fan_in = C * ksz[0] * ksz[1] * ksz[2]
    w = jax.random.normal(kw_, (OC, C, *ksz), jnp.float32) / np.sqrt(fan_in)
    b = 0.1 * jax.random.normal(kb, (OC,), jnp.float32)
    gamma = jnp.ones((OC,), jnp.float32)     # BatchNorm3d default weight init
    beta = jnp.zeros((OC,), jnp.float32)     # BatchNorm3d default bias init

    out = jax.block_until_ready(conv3d_block_forward(x, w, b, gamma, beta))
    ref = reference(x, w, b, gamma, beta)
    assert out.shape == ref.shape == (N, OC, 3, 7, 7)
    # Tolerance sized for bf16-streamed operands/intermediate (108-term conv accumulated
    # in f32; f32 ground-truth reference).
    np.testing.assert_allclose(np.asarray(out), np.asarray(ref), rtol=2e-2, atol=3e-2)
    print("KERNEL_OK")
</pallas_src>

<mosaic_0001>
module attributes {stable_mosaic.version = 11 : i64} {
  func.func @_conv_pool_stats_kernel(%arg0: i32, %arg1: memref<8x112x384xbf16, #tpu.memory_space<vmem>>, %arg2: memref<8x112xbf16, #tpu.memory_space<vmem>>, %arg3: memref<8x1xf32, #tpu.memory_space<vmem>>, %arg4: memref<8x384xbf16, #tpu.memory_space<vmem>>, %arg5: memref<1x8x1xf32, #tpu.memory_space<vmem>>, %arg6: memref<1x8x1xf32, #tpu.memory_space<vmem>>) attributes {dimension_semantics = [#tpu.dimension_semantics<parallel>], iteration_bounds = array<i64: 1>, scalar_prefetch = 0 : i64, scratch_operands = 0 : i64, tpu.core_type = #tpu.core_type<tc>, window_params = [{transform_indices = @transform_0, window_bounds = array<i64: 8, 112, 384>}, {pipeline_mode = #tpu.pipeline_mode<synchronous>, transform_indices = @transform_1, window_bounds = array<i64: 8, 112>}, {pipeline_mode = #tpu.pipeline_mode<synchronous>, transform_indices = @transform_2, window_bounds = array<i64: 8, 1>}, {transform_indices = @transform_3, window_bounds = array<i64: 8, 384>}, {transform_indices = @transform_4, window_bounds = array<i64: 1, 8, 1>}, {transform_indices = @transform_5, window_bounds = array<i64: 1, 8, 1>}]} {
    %c0 = arith.constant 0 : index
    %c0_0 = arith.constant 0 : index
    %0 = vector.load %arg2[%c0, %c0_0] : memref<8x112xbf16, #tpu.memory_space<vmem>>, vector<8x112xbf16>
    %c0_1 = arith.constant 0 : index
    %c0_2 = arith.constant 0 : index
    %c0_3 = arith.constant 0 : index
    %1 = vector.load %arg1[%c0_1, %c0_2, %c0_3] : memref<8x112x384xbf16, #tpu.memory_space<vmem>>, vector<1x112x384xbf16>
    %2 = vector.shape_cast %1 : vector<1x112x384xbf16> to vector<112x384xbf16>
    %cst = arith.constant dense<0.000000e+00> : vector<8x384xf32>
    %3 = tpu.matmul %0, %2, %cst {dimension_numbers = #tpu.dot_dimension_numbers<[1], [0], [0], [1], [0, 0, 1, 1], [], []>} : vector<8x112xbf16>, vector<112x384xbf16>, vector<8x384xf32> -> vector<8x384xf32>
    %c1 = arith.constant 1 : index
    %c0_4 = arith.constant 0 : index
    %c0_5 = arith.constant 0 : index
    %4 = vector.load %arg1[%c1, %c0_4, %c0_5] : memref<8x112x384xbf16, #tpu.memory_space<vmem>>, vector<1x112x384xbf16>
    %5 = vector.shape_cast %4 : vector<1x112x384xbf16> to vector<112x384xbf16>
    %cst_6 = arith.constant dense<0.000000e+00> : vector<8x384xf32>
    %6 = tpu.matmul %0, %5, %cst_6 {dimension_numbers = #tpu.dot_dimension_numbers<[1], [0], [0], [1], [0, 0, 1, 1], [], []>} : vector<8x112xbf16>, vector<112x384xbf16>, vector<8x384xf32> -> vector<8x384xf32>
    %7 = arith.maximumf %3, %6 : vector<8x384xf32>
    %c2 = arith.constant 2 : index
    %c0_7 = arith.constant 0 : index
    %c0_8 = arith.constant 0 : index
    %8 = vector.load %arg1[%c2, %c0_7, %c0_8] : memref<8x112x384xbf16, #tpu.memory_space<vmem>>, vector<1x112x384xbf16>
    %9 = vector.shape_cast %8 : vector<1x112x384xbf16> to vector<112x384xbf16>
    %cst_9 = arith.constant dense<0.000000e+00> : vector<8x384xf32>
    %10 = tpu.matmul %0, %9, %cst_9 {dimension_numbers = #tpu.dot_dimension_numbers<[1], [0], [0], [1], [0, 0, 1, 1], [], []>} : vector<8x112xbf16>, vector<112x384xbf16>, vector<8x384xf32> -> vector<8x384xf32>
    %11 = arith.maximumf %7, %10 : vector<8x384xf32>
    %c3 = arith.constant 3 : index
    %c0_10 = arith.constant 0 : index
    %c0_11 = arith.constant 0 : index
    %12 = vector.load %arg1[%c3, %c0_10, %c0_11] : memref<8x112x384xbf16, #tpu.memory_space<vmem>>, vector<1x112x384xbf16>
    %13 = vector.shape_cast %12 : vector<1x112x384xbf16> to vector<112x384xbf16>
    %cst_12 = arith.constant dense<0.000000e+00> : vector<8x384xf32>
    %14 = tpu.matmul %0, %13, %cst_12 {dimension_numbers = #tpu.dot_dimension_numbers<[1], [0], [0], [1], [0, 0, 1, 1], [], []>} : vector<8x112xbf16>, vector<112x384xbf16>, vector<8x384xf32> -> vector<8x384xf32>
    %15 = arith.maximumf %11, %14 : vector<8x384xf32>
    %c4 = arith.constant 4 : index
    %c0_13 = arith.constant 0 : index
    %c0_14 = arith.constant 0 : index
    %16 = vector.load %arg1[%c4, %c0_13, %c0_14] : memref<8x112x384xbf16, #tpu.memory_space<vmem>>, vector<1x112x384xbf16>
    %17 = vector.shape_cast %16 : vector<1x112x384xbf16> to vector<112x384xbf16>
    %cst_15 = arith.constant dense<0.000000e+00> : vector<8x384xf32>
    %18 = tpu.matmul %0, %17, %cst_15 {dimension_numbers = #tpu.dot_dimension_numbers<[1], [0], [0], [1], [0, 0, 1, 1], [], []>} : vector<8x112xbf16>, vector<112x384xbf16>, vector<8x384xf32> -> vector<8x384xf32>
    %19 = arith.maximumf %15, %18 : vector<8x384xf32>
    %c5 = arith.constant 5 : index
    %c0_16 = arith.constant 0 : index
    %c0_17 = arith.constant 0 : index
    %20 = vector.load %arg1[%c5, %c0_16, %c0_17] : memref<8x112x384xbf16, #tpu.memory_space<vmem>>, vector<1x112x384xbf16>
    %21 = vector.shape_cast %20 : vector<1x112x384xbf16> to vector<112x384xbf16>
    %cst_18 = arith.constant dense<0.000000e+00> : vector<8x384xf32>
    %22 = tpu.matmul %0, %21, %cst_18 {dimension_numbers = #tpu.dot_dimension_numbers<[1], [0], [0], [1], [0, 0, 1, 1], [], []>} : vector<8x112xbf16>, vector<112x384xbf16>, vector<8x384xf32> -> vector<8x384xf32>
    %23 = arith.maximumf %19, %22 : vector<8x384xf32>
    %c6 = arith.constant 6 : index
    %c0_19 = arith.constant 0 : index
    %c0_20 = arith.constant 0 : index
    %24 = vector.load %arg1[%c6, %c0_19, %c0_20] : memref<8x112x384xbf16, #tpu.memory_space<vmem>>, vector<1x112x384xbf16>
    %25 = vector.shape_cast %24 : vector<1x112x384xbf16> to vector<112x384xbf16>
    %cst_21 = arith.constant dense<0.000000e+00> : vector<8x384xf32>
    %26 = tpu.matmul %0, %25, %cst_21 {dimension_numbers = #tpu.dot_dimension_numbers<[1], [0], [0], [1], [0, 0, 1, 1], [], []>} : vector<8x112xbf16>, vector<112x384xbf16>, vector<8x384xf32> -> vector<8x384xf32>
    %27 = arith.maximumf %23, %26 : vector<8x384xf32>
    %c7 = arith.constant 7 : index
    %c0_22 = arith.constant 0 : index
    %c0_23 = arith.constant 0 : index
    %28 = vector.load %arg1[%c7, %c0_22, %c0_23] : memref<8x112x384xbf16, #tpu.memory_space<vmem>>, vector<1x112x384xbf16>
    %29 = vector.shape_cast %28 : vector<1x112x384xbf16> to vector<112x384xbf16>
    %cst_24 = arith.constant dense<0.000000e+00> : vector<8x384xf32>
    %30 = tpu.matmul %0, %29, %cst_24 {dimension_numbers = #tpu.dot_dimension_numbers<[1], [0], [0], [1], [0, 0, 1, 1], [], []>} : vector<8x112xbf16>, vector<112x384xbf16>, vector<8x384xf32> -> vector<8x384xf32>
    %31 = arith.maximumf %27, %30 : vector<8x384xf32>
    %c0_25 = arith.constant 0 : index
    %c0_26 = arith.constant 0 : index
    %32 = vector.load %arg3[%c0_25, %c0_26] : memref<8x1xf32, #tpu.memory_space<vmem>>, vector<8x1xf32>
    %33 = vector.broadcast %32 : vector<8x1xf32> to vector<8x384xf32>
    %34 = arith.addf %31, %33 : vector<8x384xf32>
    %35 = arith.truncf %34 : vector<8x384xf32> to vector<8x384xbf16>
    %c0_27 = arith.constant 0 : index
    %c0_28 = arith.constant 0 : index
    %36 = vector.load %arg4[%c0_27, %c0_28] : memref<8x384xbf16, #tpu.memory_space<vmem>>, vector<8x384xbf16>
    tpu.vector_store %arg4[%c0_27, %c0_28], %35 {strides = array<i32>} : memref<8x384xbf16, #tpu.memory_space<vmem>>, vector<8x384xbf16>,
    %cst_29 = arith.constant dense<0.000000e+00> : vector<8xf32>
    %37 = vector.multi_reduction <add>, %31, %cst_29 [1] : vector<8x384xf32> to vector<8xf32>
    %38 = vector.shape_cast %37 : vector<8xf32> to vector<8x1xf32>
    %39 = vector.shape_cast %38 : vector<8x1xf32> to vector<1x8x1xf32>
    %c0_30 = arith.constant 0 : index
    %c0_31 = arith.constant 0 : index
    %c0_32 = arith.constant 0 : index
    %40 = vector.load %arg5[%c0_30, %c0_31, %c0_32] : memref<1x8x1xf32, #tpu.memory_space<vmem>>, vector<1x8x1xf32>
    tpu.vector_store %arg5[%c0_30, %c0_31, %c0_32], %39 {strides = array<i32>} : memref<1x8x1xf32, #tpu.memory_space<vmem>>, vector<1x8x1xf32>,
    %41 = arith.mulf %31, %31 : vector<8x384xf32>
    %cst_33 = arith.constant dense<0.000000e+00> : vector<8xf32>
    %42 = vector.multi_reduction <add>, %41, %cst_33 [1] : vector<8x384xf32> to vector<8xf32>
    %43 = vector.shape_cast %42 : vector<8xf32> to vector<8x1xf32>
    %44 = vector.shape_cast %43 : vector<8x1xf32> to vector<1x8x1xf32>
    %c0_34 = arith.constant 0 : index
    %c0_35 = arith.constant 0 : index
    %c0_36 = arith.constant 0 : index
    %45 = vector.load %arg6[%c0_34, %c0_35, %c0_36] : memref<1x8x1xf32, #tpu.memory_space<vmem>>, vector<1x8x1xf32>
    tpu.vector_store %arg6[%c0_34, %c0_35, %c0_36], %44 {strides = array<i32>} : memref<1x8x1xf32, #tpu.memory_space<vmem>>, vector<1x8x1xf32>,
    return
  }
  func.func @transform_0(%arg0: i32) -> (i32, i32, i32) {
    %c0_i32 = arith.constant 0 : i32
    %c0_i32_0 = arith.constant 0 : i32
    %c0_i32_1 = arith.constant 0 : i32
    return %c0_i32, %c0_i32_0, %arg0 : i32, i32, i32
  }
  func.func @transform_1(%arg0: i32) -> (i32, i32) {
    %c0_i32 = arith.constant 0 : i32
    %c0_i32_0 = arith.constant 0 : i32
    %c0_i32_1 = arith.constant 0 : i32
    return %c0_i32, %c0_i32_0 : i32, i32
  }
  func.func @transform_2(%arg0: i32) -> (i32, i32) {
    %c0_i32 = arith.constant 0 : i32
    %c0_i32_0 = arith.constant 0 : i32
    %c0_i32_1 = arith.constant 0 : i32
    return %c0_i32, %c0_i32_0 : i32, i32
  }
  func.func @transform_3(%arg0: i32) -> (i32, i32) {
    %c0_i32 = arith.constant 0 : i32
    %c0_i32_0 = arith.constant 0 : i32
    return %c0_i32, %arg0 : i32, i32
  }
  func.func @transform_4(%arg0: i32) -> (i32, i32, i32) {
    %c0_i32 = arith.constant 0 : i32
    %c0_i32_0 = arith.constant 0 : i32
    %c0_i32_1 = arith.constant 0 : i32
    return %arg0, %c0_i32, %c0_i32_0 : i32, i32, i32
  }
  func.func @transform_5(%arg0: i32) -> (i32, i32, i32) {
    %c0_i32 = arith.constant 0 : i32
    %c0_i32_0 = arith.constant 0 : i32
    %c0_i32_1 = arith.constant 0 : i32
    return %arg0, %c0_i32, %c0_i32_0 : i32, i32, i32
  }
}

module attributes {stable_mosaic.version = 11 : i64} {
  func.func @_bn_lrelu_kernel(%arg0: i32, %arg1: memref<8x384xbf16, #tpu.memory_space<vmem>>, %arg2: memref<8x1xf32, #tpu.memory_space<vmem>>, %arg3: memref<8x1xf32, #tpu.memory_space<vmem>>, %arg4: memref<8x384xf32, #tpu.memory_space<vmem>>) attributes {dimension_semantics = [#tpu.dimension_semantics<parallel>], iteration_bounds = array<i64: 1>, scalar_prefetch = 0 : i64, scratch_operands = 0 : i64, tpu.core_type = #tpu.core_type<tc>, window_params = [{transform_indices = @transform_0, window_bounds = array<i64: 8, 384>}, {pipeline_mode = #tpu.pipeline_mode<synchronous>, transform_indices = @transform_1, window_bounds = array<i64: 8, 1>}, {pipeline_mode = #tpu.pipeline_mode<synchronous>, transform_indices = @transform_2, window_bounds = array<i64: 8, 1>}, {transform_indices = @transform_3, window_bounds = array<i64: 8, 384>}]} {
    %c0 = arith.constant 0 : index
    %c0_0 = arith.constant 0 : index
    %0 = vector.load %arg1[%c0, %c0_0] : memref<8x384xbf16, #tpu.memory_space<vmem>>, vector<8x384xbf16>
    %1 = arith.extf %0 : vector<8x384xbf16> to vector<8x384xf32>
    %c0_1 = arith.constant 0 : index
    %c0_2 = arith.constant 0 : index
    %2 = vector.load %arg2[%c0_1, %c0_2] : memref<8x1xf32, #tpu.memory_space<vmem>>, vector<8x1xf32>
    %3 = vector.broadcast %2 : vector<8x1xf32> to vector<8x384xf32>
    %4 = arith.mulf %1, %3 : vector<8x384xf32>
    %c0_3 = arith.constant 0 : index
    %c0_4 = arith.constant 0 : index
    %5 = vector.load %arg3[%c0_3, %c0_4] : memref<8x1xf32, #tpu.memory_space<vmem>>, vector<8x1xf32>
    %6 = vector.broadcast %5 : vector<8x1xf32> to vector<8x384xf32>
    %7 = arith.addf %4, %6 : vector<8x384xf32>
    %cst = arith.constant 0.000000e+00 : f32
    %8 = vector.broadcast %cst : f32 to vector<8x384xf32>
    %9 = arith.cmpf oge, %7, %8 : vector<8x384xf32>
    %cst_5 = arith.constant 0.00999999977 : f32
    %10 = vector.broadcast %cst_5 : f32 to vector<8x384xf32>
    %11 = arith.mulf %10, %7 : vector<8x384xf32>
    %12 = arith.select %9, %7, %11 : vector<8x384xi1>, vector<8x384xf32>
    %c0_6 = arith.constant 0 : index
    %c0_7 = arith.constant 0 : index
    %13 = vector.load %arg4[%c0_6, %c0_7] : memref<8x384xf32, #tpu.memory_space<vmem>>, vector<8x384xf32>
    tpu.vector_store %arg4[%c0_6, %c0_7], %12 {strides = array<i32>} : memref<8x384xf32, #tpu.memory_space<vmem>>, vector<8x384xf32>,
    return
  }
  func.func @transform_0(%arg0: i32) -> (i32, i32) {
    %c0_i32 = arith.constant 0 : i32
    %c0_i32_0 = arith.constant 0 : i32
    return %c0_i32, %arg0 : i32, i32
  }
  func.func @transform_1(%arg0: i32) -> (i32, i32) {
    %c0_i32 = arith.constant 0 : i32
    %c0_i32_0 = arith.constant 0 : i32
    %c0_i32_1 = arith.constant 0 : i32
    return %c0_i32, %c0_i32_0 : i32, i32
  }
  func.func @transform_2(%arg0: i32) -> (i32, i32) {
    %c0_i32 = arith.constant 0 : i32
    %c0_i32_0 = arith.constant 0 : i32
    %c0_i32_1 = arith.constant 0 : i32
    return %c0_i32, %c0_i32_0 : i32, i32
  }
  func.func @transform_3(%arg0: i32) -> (i32, i32) {
    %c0_i32 = arith.constant 0 : i32
    %c0_i32_0 = arith.constant 0 : i32
    return %c0_i32, %arg0 : i32, i32
  }
}

</mosaic_0001>

<bundles_post_ra>
// kernel: conv3d_block_forward.2
= control target key start
LH: loop header
LB: loop body
LE: loop exit
PB: predicated region body
PF: predicated region fallthrough
CT: control target
= control target key end

     0   :  { %vm159_vm0 = vcmask 916480   ;;  %vm1500_vm1 = vcmask 7168   ;;  %s3691_s0 = inlined_call_operand.vmem [shape: bf16[8,112,384], index: 0, kind: input, shape index: {}]   ;;  %s3692_s1 = inlined_call_operand.vmem [shape: bf16[8,112], index: 1, kind: input, shape index: {}]   ;;  %s3693_s2 = inlined_call_operand.vmem [shape: f32[8,1], index: 2, kind: input, shape index: {}]   ;;  %s3694_s3 = inlined_call_operand.vmem [shape: bf16[8,384], index: 3, kind: output, shape index: {0}]   ;;  %s3695_s4 = inlined_call_operand.vmem [shape: f32[1,8,1], index: 4, kind: output, shape index: {1}]   ;;  %s3696_s5 = inlined_call_operand.vmem [shape: f32[1,8,1], index: 5, kind: output, shape index: {2}]  }
   0x1   :  { %v1596_v0 = vld [vmem:[%s3691_s0 + $0x90] sm:$0xf]  ;;  %v2433_v1 = vld [vmem:[%s3691_s0 + $0x98] sm:$0xf0]  ;;  %v2432_v2 = vld [vmem:[%s3691_s0 + $0x94] sm:$0xf] }
   0x2   :  { %v1597_v3 = vor.u32 %v2433_v1, %v1596_v0  ;;  %v1598_v4 = vld [vmem:[%s3691_s0 + $0x9c] sm:$0xf0]  ;;  %v1604_v5 = vld [vmem:[%s3691_s0 + $0x98] sm:$0xf]  ;;  %v2434_v6 = vld [vmem:[%s3691_s0 + $0xa0] sm:$0xf0] }
   0x3   :  { %v1601_v7 = vor.u32 %v2432_v2, %v1598_v4  ;;  %v1605_v8 = vor.u32 %v2434_v6, %v1604_v5  ;;  %v1711_v9 = vld [vmem:[%s3691_s0 + $0x138] sm:$0xf]  ;;  %v2454_v10 = vld [vmem:[%s3691_s0 + $0x140] sm:$0xf0]  ;;  %v2429_v14 = vld [vmem:[%s3691_s0 + $0x7c] sm:$0xf] }
   0x4   :  { %v1584_v11 = vld [vmem:[%s3691_s0 + $0x78] sm:$0xf]  ;;  %164 = vmatpush.bf16.msra.mxu0 %v1597_v3  ;;  %v1712_v12 = vor.u32 %v2454_v10, %v1711_v9  ;;  %v2430_v13 = vld [vmem:[%s3691_s0 + $0x80] sm:$0xf0]  ;;  %v1586_v15 = vld [vmem:[%s3691_s0 + $0x84] sm:$0xf0] }
   0x5   :  { %177 = vmatpush.bf16.msra.mxu1 %v1601_v7  ;;  %190 = vmatpush.bf16.msra.mxu2 %v1605_v8  ;;  %v1585_v16 = vor.u32 %v2430_v13, %v1584_v11  ;;  %v1589_v17 = vor.u32 %v2429_v14, %v1586_v15  ;;  %v1592_v18 = vld [vmem:[%s3691_s0 + $0x80] sm:$0xf]  ;;  %v2431_v19 = vld [vmem:[%s3691_s0 + $0x88] sm:$0xf0]  ;;  %v2426_v26 = vld [vmem:[%s3691_s0 + $0x64] sm:$0xf] }
   0x6   :  { %v1699_v20 = vld [vmem:[%s3691_s0 + $0x120] sm:$0xf]  ;;  %344 = vmatpush.bf16.msra.mxu3 %v1712_v12  ;;  %v1593_v21 = vor.u32 %v2431_v19, %v1592_v18  ;;  %v2451_v22 = vld [vmem:[%s3691_s0 + $0x128] sm:$0xf0]  ;;  %v1574_v27 = vld [vmem:[%s3691_s0 + $0x6c] sm:$0xf0] }
   0x7   :  { %v1572_v23 = vld [vmem:[%s3691_s0 + $0x60] sm:$0xf]  ;;  %v2427_v24 = vld [vmem:[%s3691_s0 + $0x68] sm:$0xf0]  ;;  %v1700_v25 = vor.u32 %v2451_v22, %v1699_v20  ;;  %v1580_v28 = vld [vmem:[%s3691_s0 + $0x68] sm:$0xf]  ;;  %v1577_v33 = vor.u32 %v2426_v26, %v1574_v27 }
   0x8   :  { %165 = vmatpush.bf16.msra.mxu0 %v1585_v16  ;;  %v1573_v29 = vor.u32 %v2427_v24, %v1572_v23  ;;  %v2428_v30 = vld [vmem:[%s3691_s0 + $0x70] sm:$0xf0]  ;;  %v1687_v31 = vld [vmem:[%s3691_s0 + $0x108] sm:$0xf]  ;;  %v2423_v37 = vld [vmem:[%s3691_s0 + $0x4c] sm:$0xf] }
   0x9   :  { %v2448_v32 = vld [vmem:[%s3691_s0 + $0x110] sm:$0xf0]  ;;  %178 = vmatpush.bf16.msra.mxu1 %v1589_v17  ;;  %191 = vmatpush.bf16.msra.mxu2 %v1593_v21  ;;  %v1581_v34 = vor.u32 %v2428_v30, %v1580_v28  ;;  %v1560_v35 = vld [vmem:[%s3691_s0 + $0x48] sm:$0xf]  ;;  %v1562_v39 = vld [vmem:[%s3691_s0 + $0x54] sm:$0xf0] }
   0xa   :  { %v2424_v36 = vld [vmem:[%s3691_s0 + $0x50] sm:$0xf0]  ;;  %345 = vmatpush.bf16.msra.mxu3 %v1700_v25  ;;  %v1688_v38 = vor.u32 %v2448_v32, %v1687_v31  ;;  %v1568_v40 = vld [vmem:[%s3691_s0 + $0x50] sm:$0xf]  ;;  %v2425_v41 = vld [vmem:[%s3691_s0 + $0x58] sm:$0xf0]  ;;  %v1565_v45 = vor.u32 %v2423_v37, %v1562_v39 }
   0xb   :  { %v1675_v42 = vld [vmem:[%s3691_s0 + $0xf0] sm:$0xf]  ;;  %v2445_v43 = vld [vmem:[%s3691_s0 + $0xf8] sm:$0xf0]  ;;  %v1561_v44 = vor.u32 %v2424_v36, %v1560_v35  ;;  %v1569_v46 = vor.u32 %v2425_v41, %v1568_v40  ;;  %v2420_v49 = vld [vmem:[%s3691_s0 + $0x34] sm:$0xf] }
   0xc   :  { %166 = vmatpush.bf16.msra.mxu0 %v1573_v29  ;;  %v1548_v47 = vld [vmem:[%s3691_s0 + $0x30] sm:$0xf]  ;;  %v2421_v48 = vld [vmem:[%s3691_s0 + $0x38] sm:$0xf0]  ;;  %v1676_v50 = vor.u32 %v2445_v43, %v1675_v42  ;;  %v1550_v51 = vld [vmem:[%s3691_s0 + $0x3c] sm:$0xf0] }
   0xd   :  { %179 = vmatpush.bf16.msra.mxu1 %v1577_v33  ;;  %192 = vmatpush.bf16.msra.mxu2 %v1581_v34  ;;  %v1556_v52 = vld [vmem:[%s3691_s0 + $0x38] sm:$0xf]  ;;  %v2422_v53 = vld [vmem:[%s3691_s0 + $0x40] sm:$0xf0]  ;;  %v1549_v56 = vor.u32 %v2421_v48, %v1548_v47  ;;  %v1553_v57 = vor.u32 %v2420_v49, %v1550_v51  ;;  %v2417_v61 = vld [vmem:[%s3691_s0 + $0x1c] sm:$0xf] }
   0xe   :  { %346 = vmatpush.bf16.msra.mxu3 %v1688_v38  ;;  %v1663_v54 = vld [vmem:[%s3691_s0 + $0xd8] sm:$0xf]  ;;  %v2442_v55 = vld [vmem:[%s3691_s0 + $0xe0] sm:$0xf0]  ;;  %v1557_v58 = vor.u32 %v2422_v53, %v1556_v52  ;;  %v1538_v63 = vld [vmem:[%s3691_s0 + $0x24] sm:$0xf0] }
   0xf   :  { %v1536_v59 = vld [vmem:[%s3691_s0 + $0x18] sm:$0xf]  ;;  %v2418_v60 = vld [vmem:[%s3691_s0 + $0x20] sm:$0xf0]  ;;  %v1664_v62 = vor.u32 %v2442_v55, %v1663_v54  ;;  %v1544_v0 = vld [vmem:[%s3691_s0 + $0x20] sm:$0xf]  ;;  %v1541_v7 = vor.u32 %v2417_v61, %v1538_v63 }
  0x10   :  { %167 = vmatpush.bf16.msra.mxu0 %v1561_v44  ;;  %v2419_v1 = vld [vmem:[%s3691_s0 + $0x28] sm:$0xf0]  ;;  %v1651_v2 = vld [vmem:[%s3691_s0 + $0xc0] sm:$0xf]  ;;  %v1537_v4 = vor.u32 %v2418_v60, %v1536_v59  ;;  %v2414_v9 = vld [vmem:[%s3691_s0 + $0x4] sm:$0xf] }
  0x11   :  { %180 = vmatpush.bf16.msra.mxu1 %v1565_v45  ;;  %193 = vmatpush.bf16.msra.mxu2 %v1569_v46  ;;  %v2439_v3 = vld [vmem:[%s3691_s0 + $0xc8] sm:$0xf0]  ;;  %v1524_v5 = vld [vmem:[%s3691_s0] sm:$0xf]  ;;  %v1545_v8 = vor.u32 %v2419_v1, %v1544_v0  ;;  %v1526_v10 = vld [vmem:[%s3691_s0 + $0xc] sm:$0xf0] }
  0x12   :  { %347 = vmatpush.bf16.msra.mxu3 %v1676_v50  ;;  %v2415_v6 = vld [vmem:[%s3691_s0 + $0x8] sm:$0xf0]  ;;  %v1532_v11 = vld [vmem:[%s3691_s0 + $0x8] sm:$0xf]  ;;  %v1652_v12 = vor.u32 %v2439_v3, %v1651_v2  ;;  %v2416_v13 = vld [vmem:[%s3691_s0 + $0x10] sm:$0xf0]  ;;  %v1529_v23 = vor.u32 %v2414_v9, %v1526_v10 }
  0x13   :  { %v1639_v14 = vld [vmem:[%s3691_s0 + $0xa8] sm:$0xf]  ;;  %v2436_v15 = vld [vmem:[%s3691_s0 + $0xb0] sm:$0xf0]  ;;  %v2453_v16 = vld [vmem:[%s3691_s0 + $0x13c] sm:$0xf]  ;;  %v1525_v19 = vor.u32 %v2415_v6, %v1524_v5  ;;  %v1533_v24 = vor.u32 %v2416_v13, %v1532_v11 }
  0x14   :  { %168 = vmatpush.bf16.msra.mxu0 %v1549_v56  ;;  %v1713_v17 = vld [vmem:[%s3691_s0 + $0x144] sm:$0xf0]  ;;  %v1719_v18 = vld [vmem:[%s3691_s0 + $0x140] sm:$0xf]  ;;  %v2455_v20 = vld [vmem:[%s3691_s0 + $0x148] sm:$0xf0]  ;;  %v1640_v27 = vor.u32 %v2436_v15, %v1639_v14 }
  0x15   :  { %181 = vmatpush.bf16.msra.mxu1 %v1553_v57  ;;  %194 = vmatpush.bf16.msra.mxu2 %v1557_v58  ;;  %v1826_v21 = vld [vmem:[%s3691_s0 + $0x1e0] sm:$0xf]  ;;  %v2475_v22 = vld [vmem:[%s3691_s0 + $0x1e8] sm:$0xf0]  ;;  %v2474_v25 = vld [vmem:[%s3691_s0 + $0x1e4] sm:$0xf]  ;;  %v1716_v28 = vor.u32 %v2453_v16, %v1713_v17  ;;  %v1720_v30 = vor.u32 %v2455_v20, %v1719_v18 }
  0x16   :  { %348 = vmatpush.bf16.msra.mxu3 %v1664_v62  ;;  %v1828_v26 = vld [vmem:[%s3691_s0 + $0x1ec] sm:$0xf0]  ;;  %v2450_v29 = vld [vmem:[%s3691_s0 + $0x124] sm:$0xf]  ;;  %v1827_v31 = vor.u32 %v2475_v22, %v1826_v21  ;;  %v1707_v33 = vld [vmem:[%s3691_s0 + $0x128] sm:$0xf] }
  0x17   :  { %v1701_v32 = vld [vmem:[%s3691_s0 + $0x12c] sm:$0xf0]  ;;  %v2452_v34 = vld [vmem:[%s3691_s0 + $0x130] sm:$0xf0]  ;;  %v1831_v35 = vor.u32 %v2474_v25, %v1828_v26  ;;  %v1814_v36 = vld [vmem:[%s3691_s0 + $0x1c8] sm:$0xf] }
  0x18   :  { %169 = vmatpush.bf16.msra.mxu0 %v1537_v4  ;;  %v2472_v37 = vld [vmem:[%s3691_s0 + $0x1d0] sm:$0xf0]  ;;  %v2471_v38 = vld [vmem:[%s3691_s0 + $0x1cc] sm:$0xf]  ;;  %v1816_v39 = vld [vmem:[%s3691_s0 + $0x1d4] sm:$0xf0]  ;;  %v1704_v41 = vor.u32 %v2450_v29, %v1701_v32  ;;  %v1708_v42 = vor.u32 %v2452_v34, %v1707_v33 }
  0x19   :  { %182 = vmatpush.bf16.msra.mxu1 %v1541_v7  ;;  %195 = vmatpush.bf16.msra.mxu2 %v1545_v8  ;;  %v2835_v40 = vld [vmem:[%s3692_s1] sm:$0xf]  ;;  %v1815_v43 = vor.u32 %v2472_v37, %v1814_v36  ;;  %v2447_v44 = vld [vmem:[%s3691_s0 + $0x10c] sm:$0xf]  ;;  %v1689_v45 = vld [vmem:[%s3691_s0 + $0x114] sm:$0xf0]  ;;  %v1819_v47 = vor.u32 %v2471_v38, %v1816_v39 }
  0x1a   :  { %349 = vmatpush.bf16.msra.mxu3 %v1652_v12  ;;  %v1695_v46 = vld [vmem:[%s3691_s0 + $0x110] sm:$0xf]  ;;  %v2449_v48 = vld [vmem:[%s3691_s0 + $0x118] sm:$0xf0]  ;;  %v2468_v51 = vld [vmem:[%s3691_s0 + $0x1b4] sm:$0xf]  ;;  %v1692_v53 = vor.u32 %v2447_v44, %v1689_v45 }
  0x1b   :  { %v1802_v49 = vld [vmem:[%s3691_s0 + $0x1b0] sm:$0xf]  ;;  %v2469_v50 = vld [vmem:[%s3691_s0 + $0x1b8] sm:$0xf0]  ;;  %v1804_v52 = vld [vmem:[%s3691_s0 + $0x1bc] sm:$0xf0]  ;;  %v1696_v54 = vor.u32 %v2449_v48, %v1695_v46 }
  0x1c   :  { %170 = vmatpush.bf16.msra.mxu0 %v1525_v19  ;;  %v1803_v55 = vor.u32 %v2469_v50, %v1802_v49  ;;  %v2444_v56 = vld [vmem:[%s3691_s0 + $0xf4] sm:$0xf]  ;;  %v1677_v57 = vld [vmem:[%s3691_s0 + $0xfc] sm:$0xf0]  ;;  %v1683_v58 = vld [vmem:[%s3691_s0 + $0xf8] sm:$0xf]  ;;  %v1807_v59 = vor.u32 %v2468_v51, %v1804_v52 }
  0x1d   :  { %183 = vmatpush.bf16.msra.mxu1 %v1529_v23  ;;  %196 = vmatpush.bf16.msra.mxu2 %v1533_v24  ;;  %v2446_v60 = vld [vmem:[%s3691_s0 + $0x100] sm:$0xf0]  ;;  %v1790_v61 = vld [vmem:[%s3691_s0 + $0x198] sm:$0xf]  ;;  %v2465_v63 = vld [vmem:[%s3691_s0 + $0x19c] sm:$0xf]  ;;  %v1680_v1 = vor.u32 %v2444_v56, %v1677_v57 }
  0x1e   :  { %350 = vmatpush.bf16.msra.mxu3 %v1640_v27  ;;  %v2466_v62 = vld [vmem:[%s3691_s0 + $0x1a0] sm:$0xf0]  ;;  %v1792_v0 = vld [vmem:[%s3691_s0 + $0x1a4] sm:$0xf0]  ;;  %v1684_v2 = vor.u32 %v2446_v60, %v1683_v58  ;;  %v2441_v4 = vld [vmem:[%s3691_s0 + $0xdc] sm:$0xf] }
  0x1f   :  { %1606 = vmatmul.msk.bf16.vlgmr.msra.gmra.mxu0 %vm159_vm0, %v2835_v40  ;;  %v1791_v3 = vor.u32 %v2466_v62, %v1790_v61  ;;  %v1665_v5 = vld [vmem:[%s3691_s0 + $0xe4] sm:$0xf0]  ;;  %v1671_v6 = vld [vmem:[%s3691_s0 + $0xe0] sm:$0xf]  ;;  %v1795_v7 = vor.u32 %v2465_v63, %v1792_v0  ;;  %v2443_v8 = vld [vmem:[%s3691_s0 + $0xe8] sm:$0xf0] }
  0x20   :  { %357 = vmatpush.bf16.msrb.mxu0 %v1716_v28  ;;  %1608 = vmatmul.msk.bf16.vlgmr.msra.gmra.mxu2 %vm159_vm0, %v2835_v40  ;;  %v1778_v9 = vld [vmem:[%s3691_s0 + $0x180] sm:$0xf]  ;;  %v2463_v10 = vld [vmem:[%s3691_s0 + $0x188] sm:$0xf0]  ;;  %v2462_v11 = vld [vmem:[%s3691_s0 + $0x184] sm:$0xf]  ;;  %v1668_v13 = vor.u32 %v2441_v4, %v1665_v5  ;;  %v1672_v14 = vor.u32 %v2443_v8, %v1671_v6 }
  0x21   :  { %370 = vmatpush.bf16.msrb.mxu1 %v1720_v30  ;;  %527 = vmatpush.bf16.msrb.mxu2 %v1827_v31  ;;  %v1780_v12 = vld [vmem:[%s3691_s0 + $0x18c] sm:$0xf0]  ;;  %v1779_v15 = vor.u32 %v2463_v10, %v1778_v9  ;;  %v2438_v16 = vld [vmem:[%s3691_s0 + $0xc4] sm:$0xf]  ;;  %v1659_v18 = vld [vmem:[%s3691_s0 + $0xc8] sm:$0xf] }
  0x22   :  { %540 = vmatpush.bf16.msrb.mxu3 %v1831_v35  ;;  %1607 = vmatmul.msk.bf16.vlgmr.msra.gmra.mxu1 %vm159_vm0, %v2835_v40  ;;  %v1653_v17 = vld [vmem:[%s3691_s0 + $0xcc] sm:$0xf0]  ;;  %v1783_v19 = vor.u32 %v2462_v11, %v1780_v12  ;;  %v2440_v20 = vld [vmem:[%s3691_s0 + $0xd0] sm:$0xf0]  ;;  %v1766_v21 = vld [vmem:[%s3691_s0 + $0x168] sm:$0xf] }
  0x23   :  { %1721 = vmatmul.msk.bf16.vlgmr.msra.gmra.mxu3 %vm159_vm0, %v2835_v40  ;;  %v2460_v22 = vld [vmem:[%s3691_s0 + $0x170] sm:$0xf0]  ;;  %v2459_v23 = vld [vmem:[%s3691_s0 + $0x16c] sm:$0xf]  ;;  %v1768_v24 = vld [vmem:[%s3691_s0 + $0x174] sm:$0xf0]  ;;  %v1656_v25 = vor.u32 %v2438_v16, %v1653_v17  ;;  %v1660_v28 = vor.u32 %v2440_v20, %v1659_v18 }
  0x24   :  { %358 = vmatpush.bf16.msrb.mxu0 %v1704_v41  ;;  %v2435_v26 = vld [vmem:[%s3691_s0 + $0xac] sm:$0xf]  ;;  %v1641_v27 = vld [vmem:[%s3691_s0 + $0xb4] sm:$0xf0]  ;;  %v1767_v29 = vor.u32 %v2460_v22, %v1766_v21  ;;  %v1647_v30 = vld [vmem:[%s3691_s0 + $0xb0] sm:$0xf]  ;;  %v1771_v33 = vor.u32 %v2459_v23, %v1768_v24 }
  0x25   :  { %371 = vmatpush.bf16.msrb.mxu1 %v1708_v42  ;;  %528 = vmatpush.bf16.msrb.mxu2 %v1815_v43  ;;  %v2437_v31 = vld [vmem:[%s3691_s0 + $0xb8] sm:$0xf0]  ;;  %v1754_v32 = vld [vmem:[%s3691_s0 + $0x150] sm:$0xf]  ;;  %v2456_v35 = vld [vmem:[%s3691_s0 + $0x154] sm:$0xf]  ;;  %v1644_v41 = vor.u32 %v2435_v26, %v1641_v27 }
  0x26   :  { %541 = vmatpush.bf16.msrb.mxu3 %v1819_v47  ;;  %v2457_v34 = vld [vmem:[%s3691_s0 + $0x158] sm:$0xf0]  ;;  %v1756_v36 = vld [vmem:[%s3691_s0 + $0x15c] sm:$0xf0]  ;;  %v1834_v37 = vld [vmem:[%s3691_s0 + $0x1e8] sm:$0xf]  ;;  %v1648_v45 = vor.u32 %v2437_v31, %v1647_v30 }
  0x27   :  { %v2476_v38 = vld [vmem:[%s3691_s0 + $0x1f0] sm:$0xf0]  ;;  %v1941_v39 = vld [vmem:[%s3691_s0 + $0x288] sm:$0xf]  ;;  %v2495_v43 = vld [vmem:[%s3691_s0 + $0x28c] sm:$0xf]  ;;  %v1755_v46 = vor.u32 %v2457_v34, %v1754_v32  ;;  %v1759_v49 = vor.u32 %v2456_v35, %v1756_v36 }
  0x28   :  { %359 = vmatpush.bf16.msrb.mxu0 %v1692_v53  ;;  %v2496_v42 = vld [vmem:[%s3691_s0 + $0x290] sm:$0xf0]  ;;  %v1943_v44 = vld [vmem:[%s3691_s0 + $0x294] sm:$0xf0]  ;;  %v1949_v47 = vld [vmem:[%s3691_s0 + $0x290] sm:$0xf]  ;;  %v1835_v50 = vor.u32 %v2476_v38, %v1834_v37 }
  0x29   :  { %372 = vmatpush.bf16.msrb.mxu1 %v1696_v54  ;;  %529 = vmatpush.bf16.msrb.mxu2 %v1803_v55  ;;  %v2497_v48 = vld [vmem:[%s3691_s0 + $0x298] sm:$0xf0]  ;;  %v1942_v51 = vor.u32 %v2496_v42, %v1941_v39  ;;  %v1946_v52 = vor.u32 %v2495_v43, %v1943_v44  ;;  %v1822_v53 = vld [vmem:[%s3691_s0 + $0x1d0] sm:$0xf]  ;;  %v2492_v58 = vld [vmem:[%s3691_s0 + $0x274] sm:$0xf] }
  0x2a   :  { %542 = vmatpush.bf16.msrb.mxu3 %v1807_v59  ;;  %v2473_v54 = vld [vmem:[%s3691_s0 + $0x1d8] sm:$0xf0]  ;;  %v1929_v55 = vld [vmem:[%s3691_s0 + $0x270] sm:$0xf]  ;;  %v1950_v56 = vor.u32 %v2497_v48, %v1949_v47  ;;  %v1931_v59 = vld [vmem:[%s3691_s0 + $0x27c] sm:$0xf0] }
  0x2b   :  { %v2493_v57 = vld [vmem:[%s3691_s0 + $0x278] sm:$0xf0]  ;;  %v1937_v60 = vld [vmem:[%s3691_s0 + $0x278] sm:$0xf]  ;;  %v2494_v61 = vld [vmem:[%s3691_s0 + $0x280] sm:$0xf0]  ;;  %v1823_v62 = vor.u32 %v2473_v54, %v1822_v53  ;;  %v1934_v0 = vor.u32 %v2492_v58, %v1931_v59 }
  0x2c   :  { %360 = vmatpush.bf16.msrb.mxu0 %v1680_v1  ;;  %v1930_v63 = vor.u32 %v2493_v57, %v1929_v55  ;;  %v1810_v1 = vld [vmem:[%s3691_s0 + $0x1b8] sm:$0xf]  ;;  %v1938_v4 = vor.u32 %v2494_v61, %v1937_v60  ;;  %v2490_v5 = vld [vmem:[%s3691_s0 + $0x260] sm:$0xf0]  ;;  %v2489_v6 = vld [vmem:[%s3691_s0 + $0x25c] sm:$0xf] }
  0x2d   :  { %373 = vmatpush.bf16.msrb.mxu1 %v1684_v2  ;;  %530 = vmatpush.bf16.msrb.mxu2 %v1791_v3  ;;  %v2470_v2 = vld [vmem:[%s3691_s0 + $0x1c0] sm:$0xf0]  ;;  %v1917_v3 = vld [vmem:[%s3691_s0 + $0x258] sm:$0xf]  ;;  %v1925_v8 = vld [vmem:[%s3691_s0 + $0x260] sm:$0xf] }
  0x2e   :  { %543 = vmatpush.bf16.msrb.mxu3 %v1795_v7  ;;  %v1919_v7 = vld [vmem:[%s3691_s0 + $0x264] sm:$0xf0]  ;;  %v2491_v9 = vld [vmem:[%s3691_s0 + $0x268] sm:$0xf0]  ;;  %v1811_v10 = vor.u32 %v2470_v2, %v1810_v1  ;;  %v1918_v11 = vor.u32 %v2490_v5, %v1917_v3  ;;  %v2486_v18 = vld [vmem:[%s3691_s0 + $0x244] sm:$0xf] }
  0x2f   :  { %v1922_v12 = vor.u32 %v2489_v6, %v1919_v7  ;;  %v1926_v16 = vor.u32 %v2491_v9, %v1925_v8  ;;  %v2487_v17 = vld [vmem:[%s3691_s0 + $0x248] sm:$0xf0]  ;;  %v1913_v20 = vld [vmem:[%s3691_s0 + $0x248] sm:$0xf]  ;;  %v2488_v21 = vld [vmem:[%s3691_s0 + $0x250] sm:$0xf0] }
  0x30   :  { %361 = vmatpush.bf16.msrb.mxu0 %v1668_v13  ;;  %v1798_v13 = vld [vmem:[%s3691_s0 + $0x1a0] sm:$0xf]  ;;  %v2464_v26 = vld [vmem:[%s3691_s0 + $0x190] sm:$0xf0]  ;;  %v1893_v27 = vld [vmem:[%s3691_s0 + $0x228] sm:$0xf] }
  0x31   :  { %374 = vmatpush.bf16.msrb.mxu1 %v1672_v14  ;;  %531 = vmatpush.bf16.msrb.mxu2 %v1779_v15  ;;  %v2467_v14 = vld [vmem:[%s3691_s0 + $0x1a8] sm:$0xf0]  ;;  %v1905_v15 = vld [vmem:[%s3691_s0 + $0x240] sm:$0xf]  ;;  %v1895_v31 = vld [vmem:[%s3691_s0 + $0x234] sm:$0xf0] }
  0x32   :  { %544 = vmatpush.bf16.msrb.mxu3 %v1783_v19  ;;  %v1907_v19 = vld [vmem:[%s3691_s0 + $0x24c] sm:$0xf0]  ;;  %v1799_v22 = vor.u32 %v2467_v14, %v1798_v13  ;;  %v1906_v23 = vor.u32 %v2487_v17, %v1905_v15  ;;  %v2483_v30 = vld [vmem:[%s3691_s0 + $0x22c] sm:$0xf]  ;;  %v2461_v38 = vld [vmem:[%s3691_s0 + $0x178] sm:$0xf0] }
  0x33   :  { %v1910_v24 = vor.u32 %v2486_v18, %v1907_v19  ;;  %v1901_v32 = vld [vmem:[%s3691_s0 + $0x230] sm:$0xf]  ;;  %v1898_v36 = vor.u32 %v2483_v30, %v1895_v31  ;;  %v2481_v42 = vld [vmem:[%s3691_s0 + $0x218] sm:$0xf0]  ;;  %v2480_v43 = vld [vmem:[%s3691_s0 + $0x214] sm:$0xf] }
  0x34   :  { %362 = vmatpush.bf16.msrb.mxu0 %v1656_v25  ;;  %v1786_v25 = vld [vmem:[%s3691_s0 + $0x188] sm:$0xf]  ;;  %v1774_v37 = vld [vmem:[%s3691_s0 + $0x170] sm:$0xf]  ;;  %v1883_v44 = vld [vmem:[%s3691_s0 + $0x21c] sm:$0xf0] }
  0x35   :  { %375 = vmatpush.bf16.msrb.mxu1 %v1660_v28  ;;  %532 = vmatpush.bf16.msrb.mxu2 %v1767_v29  ;;  %v1914_v28 = vor.u32 %v2488_v21, %v1913_v20  ;;  %v2484_v29 = vld [vmem:[%s3691_s0 + $0x230] sm:$0xf0]  ;;  %v1787_v34 = vor.u32 %v2464_v26, %v1786_v25  ;;  %v1881_v39 = vld [vmem:[%s3691_s0 + $0x210] sm:$0xf]  ;;  %v1775_v47 = vor.u32 %v2461_v38, %v1774_v37  ;;  %v1762_v48 = vld [vmem:[%s3691_s0 + $0x158] sm:$0xf] }
  0x36   :  { %545 = vmatpush.bf16.msrb.mxu3 %v1771_v33  ;;  %v2485_v33 = vld [vmem:[%s3691_s0 + $0x238] sm:$0xf0]  ;;  %v1894_v35 = vor.u32 %v2484_v29, %v1893_v27  ;;  %v2478_v53 = vld [vmem:[%s3691_s0 + $0x200] sm:$0xf0]  ;;  %v1877_v57 = vld [vmem:[%s3691_s0 + $0x200] sm:$0xf] }
  0x37   :  { %v2477_v54 = vld [vmem:[%s3691_s0 + $0x1fc] sm:$0xf]  ;;  %v2479_v58 = vld [vmem:[%s3691_s0 + $0x208] sm:$0xf0]  ;;  %v2056_v59 = vld [vmem:[%s3691_s0 + $0x330] sm:$0xf] }
  0x38   :  { %363 = vmatpush.bf16.msrb.mxu0 %v1644_v41  ;;  %v1902_v41 = vor.u32 %v2485_v33, %v1901_v32  ;;  %v2517_v60 = vld [vmem:[%s3691_s0 + $0x338] sm:$0xf0]  ;;  %v2516_v61 = vld [vmem:[%s3691_s0 + $0x334] sm:$0xf]  ;;  %v2518_v1 = vld [vmem:[%s3691_s0 + $0x340] sm:$0xf0]  ;;  %v1878_v6 = vor.u32 %v2479_v58, %v1877_v57 }
  0x39   :  { %376 = vmatpush.bf16.msrb.mxu1 %v1648_v45  ;;  %533 = vmatpush.bf16.msrb.mxu2 %v1755_v46  ;;  %v1889_v45 = vld [vmem:[%s3691_s0 + $0x218] sm:$0xf]  ;;  %v2482_v46 = vld [vmem:[%s3691_s0 + $0x220] sm:$0xf0]  ;;  %v2057_v7 = vor.u32 %v2517_v60, %v2056_v59  ;;  %v2046_v14 = vld [vmem:[%s3691_s0 + $0x324] sm:$0xf0] }
  0x3a   :  { %546 = vmatpush.bf16.msrb.mxu3 %v1759_v49  ;;  %v2458_v49 = vld [vmem:[%s3691_s0 + $0x160] sm:$0xf0]  ;;  %v1890_v55 = vor.u32 %v2482_v46, %v1889_v45  ;;  %v2052_v15 = vld [vmem:[%s3691_s0 + $0x320] sm:$0xf]  ;;  %v2535_v18 = vld [vmem:[%s3691_s0 + $0x3c8] sm:$0xf0] }
  0x3b   :  { %1722 = vmatmul.msk.bf16.vlgmr.msrb.gmra.mxu0 %vm159_vm0, %v2835_v40  ;;  %v2538_v5 = vld [vmem:[%s3691_s0 + $0x3e0] sm:$0xf0]  ;;  %v2159_v17 = vld [vmem:[%s3691_s0 + $0x3c0] sm:$0xf]  ;;  %v2034_v26 = vld [vmem:[%s3691_s0 + $0x30c] sm:$0xf0] }
  0x3c   :  { %553 = vmatpush.bf16.msra.mxu0 %v1835_v50  ;;  %1836 = vmatmul.msk.bf16.vlgmr.msrb.gmra.mxu2 %vm159_vm0, %v2835_v40  ;;  %v1882_v50 = vor.u32 %v2481_v42, %v1881_v39  ;;  %v2160_v25 = vor.u32 %v2535_v18, %v2159_v17  ;;  %v2040_v27 = vld [vmem:[%s3691_s0 + $0x308] sm:$0xf]  ;;  %v2532_v30 = vld [vmem:[%s3691_s0 + $0x3b0] sm:$0xf0]  ;;  %v2022_v38 = vld [vmem:[%s3691_s0 + $0x2f4] sm:$0xf0] }
  0x3d   :  { %710 = vmatpush.bf16.msra.mxu1 %v1942_v51  ;;  %723 = vmatpush.bf16.msra.mxu2 %v1946_v52  ;;  %v1886_v51 = vor.u32 %v2480_v43, %v1883_v44  ;;  %v1869_v52 = vld [vmem:[%s3691_s0 + $0x1f8] sm:$0xf]  ;;  %v2147_v29 = vld [vmem:[%s3691_s0 + $0x3a8] sm:$0xf]  ;;  %v2028_v39 = vld [vmem:[%s3691_s0 + $0x2f0] sm:$0xf] }
  0x3e   :  { %736 = vmatpush.bf16.msra.mxu3 %v1950_v56  ;;  %1723 = vmatmul.msk.bf16.vlgmr.msrb.gmra.mxu1 %vm159_vm0, %v2835_v40  ;;  %v1871_v56 = vld [vmem:[%s3691_s0 + $0x204] sm:$0xf0]  ;;  %v1870_v2 = vor.u32 %v2478_v53, %v1869_v52  ;;  %v2148_v37 = vor.u32 %v2532_v30, %v2147_v29  ;;  %v2135_v42 = vld [vmem:[%s3691_s0 + $0x390] sm:$0xf]  ;;  %v2529_v43 = vld [vmem:[%s3691_s0 + $0x398] sm:$0xf0] }
  0x3f   :  { %1837 = vmatmul.msk.bf16.vlgmr.msrb.gmra.mxu3 %vm159_vm0, %v2835_v40  ;;  %v1874_v3 = vor.u32 %v2477_v54, %v1871_v56  ;;  %v2016_v52 = vld [vmem:[%s3691_s0 + $0x2d8] sm:$0xf]  ;;  %v2506_v53 = vld [vmem:[%s3691_s0 + $0x2e0] sm:$0xf0]  ;;  %v2173_v17 = vld [vmem:[%s3691_s0 + $0x3e4] sm:$0xf0] }
  0x40   :  { %554 = vmatpush.bf16.msra.mxu0 %v1823_v62  ;;  %v1763_v62 = vor.u32 %v2458_v49, %v1762_v48  ;;  %v2505_v48 = vld [vmem:[%s3691_s0 + $0x2d8] sm:$0xf0]  ;;  %v2504_v49 = vld [vmem:[%s3691_s0 + $0x2d4] sm:$0xf]  ;;  %v2123_v54 = vld [vmem:[%s3691_s0 + $0x378] sm:$0xf]  ;;  %v2017_v58 = vor.u32 %v2506_v53, %v2016_v52 }
  0x41   :  { %711 = vmatpush.bf16.msra.mxu1 %v1930_v63  ;;  %724 = vmatpush.bf16.msra.mxu2 %v1934_v0  ;;  %v2058_v63 = vld [vmem:[%s3691_s0 + $0x33c] sm:$0xf0]  ;;  %v2064_v0 = vld [vmem:[%s3691_s0 + $0x338] sm:$0xf]  ;;  %v2502_v60 = vld [vmem:[%s3691_s0 + $0x2c0] sm:$0xf0] }
  0x42   :  { %737 = vmatpush.bf16.msra.mxu3 %v1938_v4  ;;  %v2171_v4 = vld [vmem:[%s3691_s0 + $0x3d8] sm:$0xf]  ;;  %v2061_v8 = vor.u32 %v2516_v61, %v2058_v63  ;;  %v2065_v9 = vor.u32 %v2518_v1, %v2064_v0  ;;  %v2501_v61 = vld [vmem:[%s3691_s0 + $0x2bc] sm:$0xf]  ;;  %v1998_v63 = vld [vmem:[%s3691_s0 + $0x2c4] sm:$0xf0] }
  0x43   :  { %v2172_v13 = vor.u32 %v2538_v5, %v2171_v4  ;;  %v1996_v59 = vld [vmem:[%s3691_s0 + $0x2b8] sm:$0xf]  ;;  %v2004_v0 = vld [vmem:[%s3691_s0 + $0x2c0] sm:$0xf]  ;;  %v2503_v1 = vld [vmem:[%s3691_s0 + $0x2c8] sm:$0xf0] }
  0x44   :  { %555 = vmatpush.bf16.msra.mxu0 %v1811_v10  ;;  %v2044_v10 = vld [vmem:[%s3691_s0 + $0x318] sm:$0xf]  ;;  %v1997_v4 = vor.u32 %v2502_v60, %v1996_v59  ;;  %v1984_v5 = vld [vmem:[%s3691_s0 + $0x2a0] sm:$0xf]  ;;  %v2530_v60 = vld [vmem:[%s3691_s0 + $0x3a0] sm:$0xf0] }
  0x45   :  { %712 = vmatpush.bf16.msra.mxu1 %v1918_v11  ;;  %725 = vmatpush.bf16.msra.mxu2 %v1922_v12  ;;  %v2514_v11 = vld [vmem:[%s3691_s0 + $0x320] sm:$0xf0]  ;;  %v2513_v12 = vld [vmem:[%s3691_s0 + $0x31c] sm:$0xf]  ;;  %v2179_v18 = vld [vmem:[%s3691_s0 + $0x3e0] sm:$0xf] }
  0x46   :  { %738 = vmatpush.bf16.msra.mxu3 %v1926_v16  ;;  %v2515_v16 = vld [vmem:[%s3691_s0 + $0x328] sm:$0xf0]  ;;  %v2045_v19 = vor.u32 %v2514_v11, %v2044_v10  ;;  %v2049_v20 = vor.u32 %v2513_v12, %v2046_v14  ;;  %v1986_v10 = vld [vmem:[%s3691_s0 + $0x2ac] sm:$0xf0]  ;;  %v1992_v11 = vld [vmem:[%s3691_s0 + $0x2a8] sm:$0xf] }
  0x47   :  { %v2053_v21 = vor.u32 %v2515_v16, %v2052_v15  ;;  %v2099_v14 = vld [vmem:[%s3691_s0 + $0x348] sm:$0xf]  ;;  %v2520_v15 = vld [vmem:[%s3691_s0 + $0x350] sm:$0xf0]  ;;  %v2537_v16 = vld [vmem:[%s3691_s0 + $0x3dc] sm:$0xf] }
  0x48   :  { %556 = vmatpush.bf16.msra.mxu0 %v1799_v22  ;;  %v2032_v22 = vld [vmem:[%s3691_s0 + $0x300] sm:$0xf] }
  0x49   :  { %713 = vmatpush.bf16.msra.mxu1 %v1906_v23  ;;  %726 = vmatpush.bf16.msra.mxu2 %v1910_v24  ;;  %v2511_v23 = vld [vmem:[%s3691_s0 + $0x308] sm:$0xf0]  ;;  %v2510_v24 = vld [vmem:[%s3691_s0 + $0x304] sm:$0xf]  ;;  %v2264_v52 = vld [vmem:[%s3691_s0 + $0x45c] sm:$0xf0] }
  0x4a   :  { %739 = vmatpush.bf16.msra.mxu3 %v1914_v28  ;;  %v2512_v28 = vld [vmem:[%s3691_s0 + $0x310] sm:$0xf0]  ;;  %v2033_v31 = vor.u32 %v2511_v23, %v2032_v22  ;;  %v2037_v32 = vor.u32 %v2510_v24, %v2034_v26  ;;  %v2559_v22 = vld [vmem:[%s3691_s0 + $0x488] sm:$0xf0]  ;;  %v2288_v26 = vld [vmem:[%s3691_s0 + $0x48c] sm:$0xf0] }
  0x4b   :  { %v2041_v33 = vor.u32 %v2512_v28, %v2040_v27  ;;  %v2100_v27 = vor.u32 %v2520_v15, %v2099_v14  ;;  %v2176_v28 = vor.u32 %v2537_v16, %v2173_v17  ;;  %v2522_v16 = vld [vmem:[%s3691_s0 + $0x364] sm:$0xf]  ;;  %v2113_v17 = vld [vmem:[%s3691_s0 + $0x36c] sm:$0xf0] }
  0x4c   :  { %557 = vmatpush.bf16.msra.mxu0 %v1787_v34  ;;  %v2020_v34 = vld [vmem:[%s3691_s0 + $0x2e8] sm:$0xf] }
  0x4d   :  { %714 = vmatpush.bf16.msra.mxu1 %v1894_v35  ;;  %727 = vmatpush.bf16.msra.mxu2 %v1898_v36  ;;  %v2508_v35 = vld [vmem:[%s3691_s0 + $0x2f0] sm:$0xf0]  ;;  %v2507_v36 = vld [vmem:[%s3691_s0 + $0x2ec] sm:$0xf] }
  0x4e   :  { %740 = vmatpush.bf16.msra.mxu3 %v1902_v41  ;;  %v2509_v41 = vld [vmem:[%s3691_s0 + $0x2f8] sm:$0xf0]  ;;  %v2021_v44 = vor.u32 %v2508_v35, %v2020_v34  ;;  %v2025_v45 = vor.u32 %v2507_v36, %v2022_v38  ;;  %v2536_v35 = vld [vmem:[%s3691_s0 + $0x3d0] sm:$0xf0]  ;;  %v2274_v36 = vld [vmem:[%s3691_s0 + $0x468] sm:$0xf] }
  0x4f   :  { %v2029_v46 = vor.u32 %v2509_v41, %v2028_v39  ;;  %v2555_v38 = vld [vmem:[%s3691_s0 + $0x46c] sm:$0xf]  ;;  %v2276_v39 = vld [vmem:[%s3691_s0 + $0x474] sm:$0xf0] }
  0x50   :  { %558 = vmatpush.bf16.msra.mxu0 %v1775_v47  ;;  %v2008_v47 = vld [vmem:[%s3691_s0 + $0x2d0] sm:$0xf] }
  0x51   :  { %715 = vmatpush.bf16.msra.mxu1 %v1882_v50  ;;  %728 = vmatpush.bf16.msra.mxu2 %v1886_v51  ;;  %v2136_v50 = vor.u32 %v2529_v43, %v2135_v42  ;;  %v2010_v51 = vld [vmem:[%s3691_s0 + $0x2dc] sm:$0xf0]  ;;  %v2009_v56 = vor.u32 %v2505_v48, %v2008_v47  ;;  %v2279_v47 = vor.u32 %v2555_v38, %v2276_v39  ;;  %v2533_v48 = vld [vmem:[%s3691_s0 + $0x3b8] sm:$0xf0]  ;;  %v2560_v38 = vld [vmem:[%s3691_s0 + $0x490] sm:$0xf0] }
  0x52   :  { %741 = vmatpush.bf16.msra.mxu3 %v1890_v55  ;;  %v2526_v55 = vld [vmem:[%s3691_s0 + $0x380] sm:$0xf0]  ;;  %v2013_v57 = vor.u32 %v2504_v49, %v2010_v51  ;;  %v2262_v49 = vld [vmem:[%s3691_s0 + $0x450] sm:$0xf]  ;;  %v2552_v51 = vld [vmem:[%s3691_s0 + $0x454] sm:$0xf] }
  0x53   :  { %v2267_v59 = vor.u32 %v2552_v51, %v2264_v52  ;;  %v2401_v39 = vld [vmem:[%s3691_s0 + $0x528] sm:$0xf]  ;;  %v2282_v51 = vld [vmem:[%s3691_s0 + $0x470] sm:$0xf] }
  0x54   :  { %559 = vmatpush.bf16.msra.mxu0 %v1763_v62  ;;  %v2124_v62 = vor.u32 %v2526_v55, %v2123_v54 }
  0x55   :  { %716 = vmatpush.bf16.msra.mxu1 %v1870_v2  ;;  %729 = vmatpush.bf16.msra.mxu2 %v1874_v3  ;;  %v2111_v2 = vld [vmem:[%s3691_s0 + $0x360] sm:$0xf]  ;;  %v2523_v3 = vld [vmem:[%s3691_s0 + $0x368] sm:$0xf0] }
  0x56   :  { %742 = vmatpush.bf16.msra.mxu3 %v1878_v6  ;;  %v2499_v6 = vld [vmem:[%s3691_s0 + $0x2a8] sm:$0xf0]  ;;  %v2112_v12 = vor.u32 %v2523_v3, %v2111_v2 }
  0x57   :  { %1838 = vmatmul.msk.bf16.vlgmr.msra.gmra.mxu0 %vm159_vm0, %v2835_v40 }
  0x58   :  { %893 = vmatpush.bf16.msrb.mxu0 %v2057_v7  ;;  %1951 = vmatmul.msk.bf16.vlgmr.msra.gmra.mxu1 %vm159_vm0, %v2835_v40  ;;  %v2001_v7 = vor.u32 %v2501_v61, %v1998_v63  ;;  %v2250_v61 = vld [vmem:[%s3691_s0 + $0x438] sm:$0xf]  ;;  %v2549_v63 = vld [vmem:[%s3691_s0 + $0x43c] sm:$0xf] }
  0x59   :  { %906 = vmatpush.bf16.msrb.mxu1 %v2061_v8  ;;  %919 = vmatpush.bf16.msrb.mxu2 %v2065_v9  ;;  %v2005_v8 = vor.u32 %v2503_v1, %v2004_v0  ;;  %v2498_v9 = vld [vmem:[%s3691_s0 + $0x2a4] sm:$0xf]  ;;  %v2252_v0 = vld [vmem:[%s3691_s0 + $0x444] sm:$0xf0] }
  0x5a   :  { %1076 = vmatpush.bf16.msrb.mxu3 %v2172_v13  ;;  %1952 = vmatmul.msk.bf16.vlgmr.msra.gmra.mxu2 %vm159_vm0, %v2835_v40  ;;  %v2500_v13 = vld [vmem:[%s3691_s0 + $0x2b0] sm:$0xf0]  ;;  %v1989_v23 = vor.u32 %v2498_v9, %v1986_v10  ;;  %v2238_v9 = vld [vmem:[%s3691_s0 + $0x420] sm:$0xf]  ;;  %v2547_v10 = vld [vmem:[%s3691_s0 + $0x428] sm:$0xf0] }
  0x5b   :  { %1953 = vmatmul.msk.bf16.vlgmr.msra.gmra.mxu3 %vm159_vm0, %v2835_v40  ;;  %v1993_v24 = vor.u32 %v2500_v13, %v1992_v11  ;;  %v2546_v11 = vld [vmem:[%s3691_s0 + $0x424] sm:$0xf]  ;;  %v2239_v15 = vor.u32 %v2547_v10, %v2238_v9  ;;  %v2385_v9 = vld [vmem:[%s3691_s0 + $0x500] sm:$0xf]  ;;  %v2575_v10 = vld [vmem:[%s3691_s0 + $0x508] sm:$0xf0] }
  0x5c   :  { %894 = vmatpush.bf16.msrb.mxu0 %v2045_v19  ;;  %v1985_v19 = vor.u32 %v2499_v6, %v1984_v5  ;;  %v2125_v5 = vld [vmem:[%s3691_s0 + $0x384] sm:$0xf0]  ;;  %v2131_v6 = vld [vmem:[%s3691_s0 + $0x380] sm:$0xf] }
  0x5d   :  { %907 = vmatpush.bf16.msrb.mxu1 %v2049_v20  ;;  %920 = vmatpush.bf16.msrb.mxu2 %v2053_v21  ;;  %v2539_v20 = vld [vmem:[%s3691_s0 + $0x3e8] sm:$0xf0]  ;;  %v2286_v21 = vld [vmem:[%s3691_s0 + $0x480] sm:$0xf] }
  0x5e   :  { %1077 = vmatpush.bf16.msrb.mxu3 %v2160_v25  ;;  %v2558_v25 = vld [vmem:[%s3691_s0 + $0x484] sm:$0xf]  ;;  %v2180_v29 = vor.u32 %v2539_v20, %v2179_v18  ;;  %v2287_v30 = vor.u32 %v2559_v22, %v2286_v21  ;;  %v2119_v18 = vld [vmem:[%s3691_s0 + $0x368] sm:$0xf]  ;;  %v2524_v20 = vld [vmem:[%s3691_s0 + $0x370] sm:$0xf0] }
  0x5f   :  { %v2291_v34 = vor.u32 %v2558_v25, %v2288_v26  ;;  %v2226_v21 = vld [vmem:[%s3691_s0 + $0x408] sm:$0xf]  ;;  %v2544_v22 = vld [vmem:[%s3691_s0 + $0x410] sm:$0xf0]  ;;  %v2116_v25 = vor.u32 %v2522_v16, %v2113_v17  ;;  %v2519_v26 = vld [vmem:[%s3691_s0 + $0x34c] sm:$0xf] }
  0x60   :  { %895 = vmatpush.bf16.msrb.mxu0 %v2033_v31  ;;  %v2534_v31 = vld [vmem:[%s3691_s0 + $0x3c4] sm:$0xf]  ;;  %v2551_v16 = vld [vmem:[%s3691_s0 + $0x448] sm:$0xf0]  ;;  %v2365_v17 = vld [vmem:[%s3691_s0 + $0x4e0] sm:$0xf] }
  0x61   :  { %908 = vmatpush.bf16.msrb.mxu1 %v2037_v32  ;;  %921 = vmatpush.bf16.msrb.mxu2 %v2041_v33  ;;  %v2161_v32 = vld [vmem:[%s3691_s0 + $0x3cc] sm:$0xf0]  ;;  %v2167_v33 = vld [vmem:[%s3691_s0 + $0x3c8] sm:$0xf] }
  0x62   :  { %1078 = vmatpush.bf16.msrb.mxu3 %v2148_v37  ;;  %v2556_v37 = vld [vmem:[%s3691_s0 + $0x470] sm:$0xf0]  ;;  %v2164_v41 = vor.u32 %v2534_v31, %v2161_v32  ;;  %v2168_v42 = vor.u32 %v2536_v35, %v2167_v33  ;;  %v2521_v31 = vld [vmem:[%s3691_s0 + $0x358] sm:$0xf0]  ;;  %v2214_v32 = vld [vmem:[%s3691_s0 + $0x3f0] sm:$0xf] }
  0x63   :  { %v2275_v43 = vor.u32 %v2556_v37, %v2274_v36  ;;  %v2540_v35 = vld [vmem:[%s3691_s0 + $0x3f4] sm:$0xf]  ;;  %v2216_v36 = vld [vmem:[%s3691_s0 + $0x3fc] sm:$0xf0]  ;;  %v2294_v37 = vld [vmem:[%s3691_s0 + $0x488] sm:$0xf] }
  0x64   :  { %896 = vmatpush.bf16.msrb.mxu0 %v2021_v44  ;;  %v2531_v44 = vld [vmem:[%s3691_s0 + $0x3ac] sm:$0xf] }
  0x65   :  { %909 = vmatpush.bf16.msrb.mxu1 %v2025_v45  ;;  %922 = vmatpush.bf16.msrb.mxu2 %v2029_v46  ;;  %v2149_v45 = vld [vmem:[%s3691_s0 + $0x3b4] sm:$0xf0]  ;;  %v2155_v46 = vld [vmem:[%s3691_s0 + $0x3b0] sm:$0xf] }
  0x66   :  { %1079 = vmatpush.bf16.msrb.mxu3 %v2136_v50  ;;  %v2553_v50 = vld [vmem:[%s3691_s0 + $0x458] sm:$0xf0]  ;;  %v2152_v53 = vor.u32 %v2531_v44, %v2149_v45  ;;  %v2156_v54 = vor.u32 %v2533_v48, %v2155_v46  ;;  %v2403_v44 = vld [vmem:[%s3691_s0 + $0x534] sm:$0xf0] }
  0x67   :  { %v2263_v55 = vor.u32 %v2553_v50, %v2262_v49  ;;  %v2581_v48 = vld [vmem:[%s3691_s0 + $0x538] sm:$0xf0]  ;;  %v2219_v49 = vor.u32 %v2540_v35, %v2216_v36  ;;  %v2295_v50 = vor.u32 %v2560_v38, %v2294_v37  ;;  %v2234_v38 = vld [vmem:[%s3691_s0 + $0x410] sm:$0xf] }
  0x68   :  { %897 = vmatpush.bf16.msrb.mxu0 %v2009_v56  ;;  %v2528_v56 = vld [vmem:[%s3691_s0 + $0x394] sm:$0xf] }
  0x69   :  { %910 = vmatpush.bf16.msrb.mxu1 %v2013_v57  ;;  %923 = vmatpush.bf16.msrb.mxu2 %v2017_v58  ;;  %v2137_v57 = vld [vmem:[%s3691_s0 + $0x39c] sm:$0xf0]  ;;  %v2143_v58 = vld [vmem:[%s3691_s0 + $0x398] sm:$0xf] }
  0x6a   :  { %1080 = vmatpush.bf16.msrb.mxu3 %v2124_v62  ;;  %v2550_v62 = vld [vmem:[%s3691_s0 + $0x440] sm:$0xf0]  ;;  %v2140_v1 = vor.u32 %v2528_v56, %v2137_v57  ;;  %v2144_v2 = vor.u32 %v2530_v60, %v2143_v58  ;;  %v2577_v57 = vld [vmem:[%s3691_s0 + $0x518] sm:$0xf0]  ;;  %v2576_v58 = vld [vmem:[%s3691_s0 + $0x514] sm:$0xf] }
  0x6b   :  { %v2251_v3 = vor.u32 %v2550_v62, %v2250_v61  ;;  %v2585_v60 = vmov 0   ;;  %v2397_v61 = vld [vmem:[%s3691_s0 + $0x518] sm:$0xf]  ;;  %v2578_v62 = vld [vmem:[%s3691_s0 + $0x520] sm:$0xf0] }
  0x6c   :  { %898 = vmatpush.bf16.msrb.mxu0 %v1997_v4  ;;  %v2525_v4 = vld [vmem:[%s3691_s0 + $0x37c] sm:$0xf]  ;;  %2583 = vset.pattern.permute.xlu0 %v2585_v60 }
  0x6d   :  { %911 = vmatpush.bf16.msrb.mxu1 %v2001_v7  ;;  %924 = vmatpush.bf16.msrb.mxu2 %v2005_v8  ;;  %v2255_v7 = vor.u32 %v2549_v63, %v2252_v0  ;;  %v2527_v8 = vld [vmem:[%s3691_s0 + $0x388] sm:$0xf0]  ;;  %v2128_v13 = vor.u32 %v2525_v4, %v2125_v5  ;;  %v2377_v4 = vld [vmem:[%s3691_s0 + $0x4f8] sm:$0xf]  ;;  %v2398_v5 = vor.u32 %v2578_v62, %v2397_v61 }
  0x6e   :  { %1081 = vmatpush.bf16.msrb.mxu3 %v2112_v12  ;;  %v2240_v12 = vld [vmem:[%s3691_s0 + $0x42c] sm:$0xf0]  ;;  %v2132_v14 = vor.u32 %v2527_v8, %v2131_v6  ;;  %v2574_v6 = vld [vmem:[%s3691_s0 + $0x500] sm:$0xf0]  ;;  %v2379_v8 = vld [vmem:[%s3691_s0 + $0x504] sm:$0xf0] }
  0x70   :  { %899 = vmatpush.bf16.msrb.mxu0 %v1985_v19  ;;  %v2243_v19 = vor.u32 %v2546_v11, %v2240_v12  ;;  %v1483_v11 = vld [vmem:[%s3693_s2] sm:$0xff] }
  0x71   :  { %912 = vmatpush.bf16.msrb.mxu1 %v1989_v23  ;;  %925 = vmatpush.bf16.msrb.mxu2 %v1993_v24  ;;  %v2543_v23 = vld [vmem:[%s3691_s0 + $0x40c] sm:$0xf]  ;;  %v2228_v24 = vld [vmem:[%s3691_s0 + $0x414] sm:$0xf0] }
  0x72   :  { %1082 = vmatpush.bf16.msrb.mxu3 %v2100_v27  ;;  %v2101_v27 = vld [vmem:[%s3691_s0 + $0x354] sm:$0xf0]  ;;  %v2231_v33 = vor.u32 %v2543_v23, %v2228_v24  ;;  %1486 = vperm.xlu0 %2583, %v1483_v11  }
  0x73   :  { %2066 = vmatmul.msk.bf16.vlgmr.msrb.gmra.mxu0 %vm159_vm0, %v2835_v40 }
  0x74   :  { %1089 = vmatpush.bf16.msra.mxu0 %v2176_v28  ;;  %2067 = vmatmul.msk.bf16.vlgmr.msrb.gmra.mxu1 %vm159_vm0, %v2835_v40  ;;  %v2120_v28 = vor.u32 %v2524_v20, %v2119_v18  ;;  %v2571_v18 = vld [vmem:[%s3691_s0 + $0x4e8] sm:$0xf0]  ;;  %v2367_v20 = vld [vmem:[%s3691_s0 + $0x4ec] sm:$0xf0] }
  0x75   :  { %1102 = vmatpush.bf16.msra.mxu1 %v2180_v29  ;;  %1259 = vmatpush.bf16.msra.mxu2 %v2287_v30  ;;  %v2227_v29 = vor.u32 %v2544_v22, %v2226_v21  ;;  %v2107_v30 = vld [vmem:[%s3691_s0 + $0x350] sm:$0xf]  ;;  %v2373_v21 = vld [vmem:[%s3691_s0 + $0x4e8] sm:$0xf]  ;;  %v2572_v22 = vld [vmem:[%s3691_s0 + $0x4f0] sm:$0xf0]  ;;  %v2366_v24 = vor.u32 %v2571_v18, %v2365_v17 }
  0x76   :  { %1272 = vmatpush.bf16.msra.mxu3 %v2291_v34  ;;  %2068 = vmatmul.msk.bf16.vlgmr.msrb.gmra.mxu2 %vm159_vm0, %v2835_v40  ;;  %v2541_v34 = vld [vmem:[%s3691_s0 + $0x3f8] sm:$0xf0]  ;;  %v2108_v45 = vor.u32 %v2521_v31, %v2107_v30  ;;  %v2568_v30 = vld [vmem:[%s3691_s0 + $0x4d0] sm:$0xf0]  ;;  %v2567_v31 = vld [vmem:[%s3691_s0 + $0x4cc] sm:$0xf] }
  0x77   :  { %2181 = vmatmul.msk.bf16.vlgmr.msrb.gmra.mxu3 %vm159_vm0, %v2835_v40  ;;  %v2215_v46 = vor.u32 %v2541_v34, %v2214_v32  ;;  %v2355_v32 = vld [vmem:[%s3691_s0 + $0x4d4] sm:$0xf0]  ;;  %v2569_v34 = vld [vmem:[%s3691_s0 + $0x4d8] sm:$0xf0] }
  0x78   :  { %1090 = vmatpush.bf16.msra.mxu0 %v2164_v41  ;;  %v2104_v41 = vor.u32 %v2519_v26, %v2101_v27  ;;  %v2246_v26 = vld [vmem:[%s3691_s0 + $0x428] sm:$0xf]  ;;  %v2548_v27 = vld [vmem:[%s3691_s0 + $0x430] sm:$0xf0]  ;;  %v2358_v37 = vor.u32 %v2567_v31, %v2355_v32 }
  0x79   :  { %1103 = vmatpush.bf16.msra.mxu1 %v2168_v42  ;;  %1260 = vmatpush.bf16.msra.mxu2 %v2275_v43  ;;  %v2580_v42 = vld [vmem:[%s3691_s0 + $0x530] sm:$0xf0]  ;;  %v2579_v43 = vld [vmem:[%s3691_s0 + $0x52c] sm:$0xf]  ;;  %v2247_v35 = vor.u32 %v2548_v27, %v2246_v26 }
  0x7a   :  { %1273 = vmatpush.bf16.msra.mxu3 %v2279_v47  ;;  %v2409_v47 = vld [vmem:[%s3691_s0 + $0x530] sm:$0xf]  ;;  %v2402_v52 = vor.u32 %v2580_v42, %v2401_v39  ;;  %v2545_v39 = vld [vmem:[%s3691_s0 + $0x418] sm:$0xf0] }
  0x7b   :  { %v2410_v56 = vor.u32 %v2581_v48, %v2409_v47  ;;  %v2566_v47 = vld [vmem:[%s3691_s0 + $0x4c0] sm:$0xf0]  ;;  %v2235_v48 = vor.u32 %v2545_v39, %v2234_v38 }
  0x7c   :  { %1091 = vmatpush.bf16.msra.mxu0 %v2152_v53  ;;  %v2406_v53 = vor.u32 %v2579_v43, %v2403_v44  ;;  %v2565_v43 = vld [vmem:[%s3691_s0 + $0x4b8] sm:$0xf0]  ;;  %v2564_v44 = vld [vmem:[%s3691_s0 + $0x4b4] sm:$0xf] }
  0x7d   :  { %1104 = vmatpush.bf16.msra.mxu1 %v2156_v54  ;;  %1261 = vmatpush.bf16.msra.mxu2 %v2263_v55  ;;  %v2557_v54 = vld [vmem:[%s3691_s0 + $0x478] sm:$0xf0]  ;;  %v2389_v55 = vld [vmem:[%s3691_s0 + $0x510] sm:$0xf] }
  0x7e   :  { %1274 = vmatpush.bf16.msra.mxu3 %v2267_v59  ;;  %v2391_v59 = vld [vmem:[%s3691_s0 + $0x51c] sm:$0xf0]  ;;  %v2283_v63 = vor.u32 %v2557_v54, %v2282_v51  ;;  %v2390_v0 = vor.u32 %v2577_v57, %v2389_v55  ;;  %v2222_v51 = vld [vmem:[%s3691_s0 + $0x3f8] sm:$0xf]  ;;  %v2562_v55 = vld [vmem:[%s3691_s0 + $0x4a0] sm:$0xf0] }
  0x7f   :  { %v2331_v57 = vld [vmem:[%s3691_s0 + $0x4a4] sm:$0xf0] }
  0x80   :  { %1092 = vmatpush.bf16.msra.mxu0 %v2140_v1  ;;  %v2394_v1 = vor.u32 %v2576_v58, %v2391_v59  ;;  %v2337_v58 = vld [vmem:[%s3691_s0 + $0x4a0] sm:$0xf]  ;;  %v2563_v59 = vld [vmem:[%s3691_s0 + $0x4a8] sm:$0xf0] }
  0x81   :  { %1105 = vmatpush.bf16.msra.mxu1 %v2144_v2  ;;  %1262 = vmatpush.bf16.msra.mxu2 %v2251_v3  ;;  %v2270_v2 = vld [vmem:[%s3691_s0 + $0x458] sm:$0xf]  ;;  %v2554_v3 = vld [vmem:[%s3691_s0 + $0x460] sm:$0xf0] }
  0x82   :  { %1275 = vmatpush.bf16.msra.mxu3 %v2255_v7  ;;  %v2573_v7 = vld [vmem:[%s3691_s0 + $0x4fc] sm:$0xf]  ;;  %v2271_v12 = vor.u32 %v2554_v3, %v2270_v2  ;;  %v2584_v2 = vld [vmem:[%s3692_s1] sm:$0xf] }
  0x84   :  { %1093 = vmatpush.bf16.msra.mxu0 %v2128_v13  ;;  %v2378_v13 = vor.u32 %v2574_v6, %v2377_v4 }
  0x85   :  { %1106 = vmatpush.bf16.msra.mxu1 %v2132_v14  ;;  %1263 = vmatpush.bf16.msra.mxu2 %v2239_v15  ;;  %v2382_v14 = vor.u32 %v2573_v7, %v2379_v8  ;;  %v2258_v15 = vld [vmem:[%s3691_s0 + $0x440] sm:$0xf] }
  0x86   :  { %1276 = vmatpush.bf16.msra.mxu3 %v2243_v19  ;;  %v2570_v19 = vld [vmem:[%s3691_s0 + $0x4e4] sm:$0xf]  ;;  %v2259_v23 = vor.u32 %v2551_v16, %v2258_v15 }
  0x88   :  { %1094 = vmatpush.bf16.msra.mxu0 %v2116_v25  ;;  %v2370_v25 = vor.u32 %v2570_v19, %v2367_v20 }
  0x89   :  { %1107 = vmatpush.bf16.msra.mxu1 %v2120_v28  ;;  %1264 = vmatpush.bf16.msra.mxu2 %v2227_v29  ;;  %v2353_v28 = vld [vmem:[%s3691_s0 + $0x4c8] sm:$0xf]  ;;  %v2374_v29 = vor.u32 %v2572_v22, %v2373_v21 }
  0x8a   :  { %1277 = vmatpush.bf16.msra.mxu3 %v2231_v33  ;;  %v2361_v33 = vld [vmem:[%s3691_s0 + $0x4d0] sm:$0xf]  ;;  %v2354_v36 = vor.u32 %v2568_v30, %v2353_v28 }
  0x8b   :  { %v2362_v42 = vor.u32 %v2569_v34, %v2361_v33 }
  0x8c   :  { %1095 = vmatpush.bf16.msra.mxu0 %v2104_v41  ;;  %v2341_v41 = vld [vmem:[%s3691_s0 + $0x4b0] sm:$0xf] }
  0x8d   :  { %1108 = vmatpush.bf16.msra.mxu1 %v2108_v45  ;;  %1265 = vmatpush.bf16.msra.mxu2 %v2215_v46  ;;  %v2343_v45 = vld [vmem:[%s3691_s0 + $0x4bc] sm:$0xf0]  ;;  %v2349_v46 = vld [vmem:[%s3691_s0 + $0x4b8] sm:$0xf] }
  0x8e   :  { %1278 = vmatpush.bf16.msra.mxu3 %v2219_v49  ;;  %v2342_v49 = vor.u32 %v2565_v43, %v2341_v41  ;;  %v2350_v54 = vor.u32 %v2566_v47, %v2349_v46 }
  0x8f   :  { %2182 = vmatmul.msk.bf16.vlgmr.msra.gmra.mxu0 %vm159_vm0, %v2835_v40 }
  0x90   :  { %1285 = vmatpush.bf16.msrb.mxu0 %v2295_v50  ;;  %2183 = vmatmul.msk.bf16.vlgmr.msra.gmra.mxu1 %vm159_vm0, %v2835_v40  ;;  %v2346_v50 = vor.u32 %v2564_v44, %v2343_v45 }
  0x91   :  { %1442 = vmatpush.bf16.msrb.mxu1 %v2402_v52  ;;  %1455 = vmatpush.bf16.msrb.mxu2 %v2406_v53  ;;  %v2542_v52 = vld [vmem:[%s3691_s0 + $0x400] sm:$0xf0]  ;;  %v2329_v53 = vld [vmem:[%s3691_s0 + $0x498] sm:$0xf] }
  0x92   :  { %1468 = vmatpush.bf16.msrb.mxu3 %v2410_v56  ;;  %2296 = vmatmul.msk.bf16.vlgmr.msra.gmra.mxu2 %vm159_vm0, %v2835_v40  ;;  %v2561_v56 = vld [vmem:[%s3691_s0 + $0x49c] sm:$0xf]  ;;  %v2223_v60 = vor.u32 %v2542_v52, %v2222_v51  ;;  %v2330_v61 = vor.u32 %v2562_v55, %v2329_v53 }
  0x93   :  { %2297 = vmatmul.msk.bf16.vlgmr.msra.gmra.mxu3 %vm159_vm0, %v2835_v40  ;;  %v2386_v40 = vor.u32 %v2575_v10, %v2385_v9  ;;  %v2334_v62 = vor.u32 %v2561_v56, %v2331_v57 }
  0x94   :  { %1286 = vmatpush.bf16.msrb.mxu0 %v2283_v63  ;;  %v2338_v63 = vor.u32 %v2563_v59, %v2337_v58 }
  0x95   :  { %1443 = vmatpush.bf16.msrb.mxu1 %v2390_v0  ;;  %1456 = vmatpush.bf16.msrb.mxu2 %v2394_v1 }
  0x96   :  { %1469 = vmatpush.bf16.msrb.mxu3 %v2398_v5 }
  0x98   :  { %1287 = vmatpush.bf16.msrb.mxu0 %v2271_v12 }
  0x99   :  { %1444 = vmatpush.bf16.msrb.mxu1 %v2378_v13  ;;  %1457 = vmatpush.bf16.msrb.mxu2 %v2382_v14 }
  0x9a   :  { %1470 = vmatpush.bf16.msrb.mxu3 %v2386_v40 }
  0x9c   :  { %1288 = vmatpush.bf16.msrb.mxu0 %v2259_v23  ;;  %v172_v0 = vpop.f32.mrf.mxu0 }
  0x9d   :  { %1445 = vmatpush.bf16.msrb.mxu1 %v2366_v24  ;;  %1458 = vmatpush.bf16.msrb.mxu2 %v2370_v25 }
  0x9e   :  { %1471 = vmatpush.bf16.msrb.mxu3 %v2374_v29 }
  0x9f   :  { %v185_v1 = vpop.f32.mrf.mxu1 }
  0xa0   :  { %1289 = vmatpush.bf16.msrb.mxu0 %v2247_v35 }
  0xa1   :  { %1446 = vmatpush.bf16.msrb.mxu1 %v2354_v36  ;;  %1459 = vmatpush.bf16.msrb.mxu2 %v2358_v37 }
  0xa2   :  { %1472 = vmatpush.bf16.msrb.mxu3 %v2362_v42 }
  0xa3   :  { %v198_v3 = vpop.f32.mrf.mxu2 }
  0xa4   :  { %1290 = vmatpush.bf16.msrb.mxu0 %v2235_v48  ;;  %v174_v6 = vpop.f32.mrf.mxu0 }
  0xa5   :  { %1447 = vmatpush.bf16.msrb.mxu1 %v2342_v49  ;;  %1460 = vmatpush.bf16.msrb.mxu2 %v2346_v50 }
  0xa6   :  { %1473 = vmatpush.bf16.msrb.mxu3 %v2350_v54  ;;  %v352_v4 = vpop.f32.mrf.mxu3 }
  0xa7   :  { %v382_v5 = vmax.f32 %v172_v0, %v352_v4  ;;  %v187_v7 = vpop.f32.mrf.mxu1 }
  0xa8   :  { %1291 = vmatpush.bf16.msrb.mxu0 %v2223_v60 }
  0xa9   :  { %1448 = vmatpush.bf16.msrb.mxu1 %v2330_v61  ;;  %1461 = vmatpush.bf16.msrb.mxu2 %v2334_v62 }
  0xaa   :  { %1474 = vmatpush.bf16.msrb.mxu3 %v2338_v63 }
  0xab   :  { %2298 = vmatmul.msk.bf16.vlgmr.msrb.gmra.mxu0 %vm159_vm0, %v2584_v2  ;;  %v200_v8 = vpop.f32.mrf.mxu2 }
  0xac   :  { %2411 = vmatmul.msk.bf16.vlgmr.msrb.gmra.mxu1 %vm159_vm0, %v2584_v2  ;;  %2412 = vmatmul.msk.bf16.vlgmr.msrb.gmra.mxu2 %vm159_vm0, %v2584_v2 }
  0xad   :  { %2413 = vmatmul.msk.bf16.vlgmr.msrb.gmra.mxu3 %vm159_vm0, %v2584_v2 }
  0xae   :  { %v354_v9 = vpop.f32.mrf.mxu3 }
  0xb8   :  { %v365_v10 = vpop.f32.mrf.mxu0 }
  0xb9   :  { %v383_v11 = vmax.f32 %v185_v1, %v365_v10 }
  0xbb   :  { %v378_v12 = vpop.f32.mrf.mxu1 }
  0xbc   :  { %v384_v13 = vmax.f32 %v198_v3, %v378_v12 }
  0xbf   :  { %v535_v14 = vpop.f32.mrf.mxu2 }
  0xc0   :  { %v565_v15 = vmax.f32 %v382_v5, %v535_v14  ;;  %v367_v40 = vpop.f32.mrf.mxu0 }
  0xc2   :  { %v548_v16 = vpop.f32.mrf.mxu3 }
  0xc3   :  { %v566_v17 = vmax.f32 %v383_v11, %v548_v16  ;;  %v380_v18 = vpop.f32.mrf.mxu1 }
  0xc7   :  { %v537_v19 = vpop.f32.mrf.mxu2 }
  0xca   :  { %v550_v20 = vpop.f32.mrf.mxu3 }
  0xd4   :  { %v561_v21 = vpop.f32.mrf.mxu0 }
  0xd5   :  { %v567_v22 = vmax.f32 %v384_v13, %v561_v21  ;;  %v718_v23 = vpop.f32.mrf.mxu1 }
  0xd6   :  { %v748_v24 = vmax.f32 %v565_v15, %v718_v23 }
  0xdc   :  { %v563_v28 = vpop.f32.mrf.mxu0 }
  0xdd   :  { %v731_v25 = vpop.f32.mrf.mxu2  ;;  %v720_v30 = vpop.f32.mrf.mxu1 }
  0xde   :  { %v749_v26 = vmax.f32 %v566_v17, %v731_v25  ;;  %v744_v27 = vpop.f32.mrf.mxu3 }
  0xdf   :  { %v750_v29 = vmax.f32 %v567_v22, %v744_v27 }
  0xe4   :  { %v1487_v61 = vpop.permute.xlu0 %1486 }
  0xe5   :  { %v733_v31 = vpop.f32.mrf.mxu2 }
  0xe6   :  { %v746_v32 = vpop.f32.mrf.mxu3 }
  0xf0   :  { %v901_v33 = vpop.f32.mrf.mxu0 }
  0xf1   :  { %v914_v34 = vpop.f32.mrf.mxu1  ;;  %v931_v50 = vmax.f32 %v748_v24, %v901_v33 }
  0xf2   :  { %v932_v54 = vmax.f32 %v749_v26, %v914_v34 }
  0xf8   :  { %v903_v37 = vpop.f32.mrf.mxu0 }
  0xf9   :  { %v927_v35 = vpop.f32.mrf.mxu2  ;;  %v916_v38 = vpop.f32.mrf.mxu1 }
  0xfa   :  { %v1084_v36 = vpop.f32.mrf.mxu3  ;;  %v933_v55 = vmax.f32 %v750_v29, %v927_v35 }
  0xfb   :  { %v1114_v52 = vmax.f32 %v931_v50, %v1084_v36 }
 0x101   :  { %v929_v39 = vpop.f32.mrf.mxu2 }
 0x102   :  { %v1086_v41 = vpop.f32.mrf.mxu3 }
 0x10c   :  { %v1097_v42 = vpop.f32.mrf.mxu0 }
 0x10d   :  { %v1110_v43 = vpop.f32.mrf.mxu1  ;;  %v1115_v57 = vmax.f32 %v932_v54, %v1097_v42 }
 0x10e   :  { %v1116_v58 = vmax.f32 %v933_v55, %v1110_v43 }
 0x114   :  { %v1099_v46 = vpop.f32.mrf.mxu0 }
 0x115   :  { %v1267_v44 = vpop.f32.mrf.mxu2  ;;  %v1112_v47 = vpop.f32.mrf.mxu1 }
 0x116   :  { %v1280_v45 = vpop.f32.mrf.mxu3  ;;  %v1297_v56 = vmax.f32 %v1114_v52, %v1267_v44 }
 0x117   :  { %v1298_v60 = vmax.f32 %v1115_v57, %v1280_v45 }
 0x11d   :  { %v1269_v48 = vpop.f32.mrf.mxu2 }
 0x11e   :  { %v1282_v49 = vpop.f32.mrf.mxu3 }
 0x128   :  { %v1293_v51 = vpop.f32.mrf.mxu0 }
 0x129   :  { %v1450_v53 = vpop.f32.mrf.mxu1  ;;  %v1299_v62 = vmax.f32 %v1116_v58, %v1293_v51 }
 0x12a   :  { %v1480_v59 = vmax.f32 %v1297_v56, %v1450_v53 }
 0x12c   :  { %v1489_v3 = vadd.f32 %v1487_v61, %v1480_v59  ;;  %v1502_v8 = vmul.f32 %v1480_v59, %v1480_v59 }
 0x12f   :  { %v1463_v63 = vpop.f32.mrf.mxu2 }
 0x130   :  { %v1481_v0 = vmax.f32 %v1298_v60, %v1463_v63  ;;  %v1476_v1 = vpop.f32.mrf.mxu3  ;;  %v1295_v2 = vpop.f32.mrf.mxu0 }
 0x131   :  { %v1482_v4 = vmax.f32 %v1299_v62, %v1476_v1  ;;  %v1452_v5 = vpop.f32.mrf.mxu1 }
 0x132   :  { %v1490_v6 = vadd.f32 %v1487_v61, %v1481_v0  ;;  %v1496_v7 = vadd.f32 %v1481_v0, %v1480_v59  ;;  %v1503_v9 = vmul.f32 %v1481_v0, %v1481_v0 }
 0x133   :  { %v1491_v10 = vadd.f32 %v1487_v61, %v1482_v4  ;;  %v1504_v13 = vmul.f32 %v1482_v4, %v1482_v4 }
 0x134   :  { %v1492_v11 = vpack.c.bf16 %v1490_v6, %v1489_v3  ;;  %v1497_v12 = vadd.f32 %v1496_v7, %v1482_v4  ;;  %v1505_v14 = vadd.f32 %v1503_v9, %v1502_v8 }
 0x135   :  { %v1493_v15 = vpack.c.bf16 %v1491_v10, %v1491_v10 }
 0x136   :  { %1494 = vst [vmem:[%s3694_s3] sm:$0xff] %v1492_v11  ;;  %1498 = vadd.xlane.f32.xlu0 %v1497_v12  ;;  %v1506_v16 = vadd.f32 %v1505_v14, %v1504_v13 }
 0x137   :  { %1495 = vst [vmem:[%s3694_s3 + $0x8] sm:$0xf] %v1493_v15  ;;  %v1465_v17 = vpop.f32.mrf.mxu2 }
 0x138   :  { %v1478_v40 = vpop.f32.mrf.mxu3  ;;  %1507 = vadd.xlane.f32.xlu1 %v1506_v16 }
 0x1a9   :  { %v1499_v18 = vpop.xlane.xlu0 %1498 }
 0x1aa   :  { %1501 = vst.msk [vmem:[%s3695_s4] sm:$0xff] %vm1500_vm1, %v1499_v18 }
 0x1ab   :  { %v1508_v19 = vpop.xlane.xlu1 %1507 }
 0x1ac   :  { %1509 = vst.msk [vmem:[%s3696_s5] sm:$0xff] %vm1500_vm1, %v1508_v19 }

// kernel: conv3d_block_forward.3
= control target key start
LH: loop header
LB: loop body
LE: loop exit
PB: predicated region body
PF: predicated region fallthrough
CT: control target
= control target key end

     0   :  { %v55_v0 = vmov 0   ;;  %s97_s1 = inlined_call_operand.vmem [shape: f32[8,1], index: 1, kind: input, shape index: {}]   ;;  %s98_s2 = inlined_call_operand.vmem [shape: f32[8,1], index: 2, kind: input, shape index: {}]   ;;  %s99_s0 = inlined_call_operand.vmem [shape: bf16[8,384], index: 0, kind: input, shape index: {}]   ;;  %s100_s3 = inlined_call_operand.vmem [shape: f32[8,384], index: 3, kind: output, shape index: {}]  }
   0x1   :  { %54 = vset.pattern.permute.xlu0 %v55_v0  ;;  %v19_v1 = vld [vmem:[%s97_s1] sm:$0xff]  ;;  %v15_v5 = vld [vmem:[%s99_s0 + $0x8] sm:$0xf] }
   0x2   :  { %22 = vperm.xlu0 %54, %v19_v1   ;;  %v28_v2 = vld [vmem:[%s98_s2] sm:$0xff]  ;;  %v18_v8 = vunpack.c.l.bf16 %v15_v5 }
   0x3   :  { %v14_v4 = vld [vmem:[%s99_s0] sm:$0xff] }
   0x4   :  { %v16_v6 = vunpack.c.l.bf16 %v14_v4  ;;  %v17_v7 = vunpack.c.h.bf16 %v14_v4 }
   0xa   :  { %31 = vperm.xlu0 %54, %v28_v2  }
  0x74   :  { %v23_v3 = vpop.permute.xlu0 %22 }
  0x75   :  { %v25_v9 = vmul.f32 %v23_v3, %v16_v6  ;;  %v26_v10 = vmul.f32 %v23_v3, %v17_v7  ;;  %v27_v11 = vmul.f32 %v23_v3, %v18_v8 }
  0x7c   :  { %v32_v12 = vpop.permute.xlu0 %31 }
  0x7d   :  { %v34_v13 = vadd.f32 %v32_v12, %v25_v9  ;;  %v35_v14 = vadd.f32 %v32_v12, %v26_v10  ;;  %v36_v15 = vadd.f32 %v32_v12, %v27_v11 }
  0x7f   :  { %vm37_vm0 = vcmp.ge.f32.partialorder %v34_v13, 0.0  ;;  %vm38_vm1 = vcmp.ge.f32.partialorder %v35_v14, 0.0  ;;  %vm39_vm2 = vcmp.ge.f32.partialorder %v36_v15, 0.0  ;;  %v40_v16 = vmul.f32 0.01, %v34_v13 }
  0x80   :  { %v41_v17 = vmul.f32 0.01, %v35_v14  ;;  %v42_v18 = vmul.f32 0.01, %v36_v15 }
  0x81   :  { %v43_v19 = vsel %vm37_vm0, %v34_v13, %v40_v16 }
  0x82   :  { %v44_v20 = vsel %vm38_vm1, %v35_v14, %v41_v17  ;;  %v45_v21 = vsel %vm39_vm2, %v36_v15, %v42_v18  ;;  %46 = vst [vmem:[%s100_s3] sm:$0xff] %v43_v19 }
  0x83   :  { %47 = vst [vmem:[%s100_s3 + $0x8] sm:$0xff] %v44_v20 }
  0x84   :  { %48 = vst [vmem:[%s100_s3 + $0x10] sm:$0xff] %v45_v21 }

</bundles_post_ra>
